<compile_context>
chip_gen: v7x
topology: tpu7x:2x2x1
jax: 0.10.0
libtpu: 0.0.40
codegen_flags: <defaults>
</compile_context>

<pallas_src>
import jax
import jax.numpy as jnp
from jax.experimental import pallas as pl
from jax.experimental.pallas import tpu as pltpu

EPS = 1e-5  # nn.LayerNorm default


def _make_glfb_kernel(nb, s_valid, s_pad):
    """Build the kernel for a (nb, C, s_pad) block; s_valid <= s_pad."""
    needs_mask = s_pad != s_valid
    inv_s = 1.0 / float(s_valid)

    def layer_norm(v, gamma, beta, inv_n, lane_mask):
        # Two-pass statistics (mean, then centered variance): matches PyTorch
        # LayerNorm numerics; avoids E[x^2]-mu^2 cancellation.
        if lane_mask is not None:
            v = jnp.where(lane_mask, v, 0.0)
        mu = jnp.sum(v) * inv_n
        d = v - mu
        if lane_mask is not None:
            d = jnp.where(lane_mask, d, 0.0)
        var = jnp.sum(d * d) * inv_n
        return d * jax.lax.rsqrt(var + EPS) * gamma + beta

    def kernel(
        x_ref,
        g1_ref, be1_ref,                      # LayerNorm 1 affine (C, S)
        w1_ref, b1_ref,                       # conv1x1 C -> 2C (depthwise folded in)
        w2_ref, b2_ref,                       # conv1x1 2C ->  C
        caw_ref, cab_ref,                     # channel attention conv C -> C
        w3_ref, b3_ref,                       # conv1x1  C ->  C
        g2_ref, be2_ref,                      # LayerNorm 2 affine (C, S)
        w45_ref, b45_ref,                     # fused conv1x1 (w5 @ w4): C -> C
        w6_ref, b6_ref,                       # conv1x1  C ->  C
        o_ref,
    ):
        C = x_ref.shape[1]
        inv_n = 1.0 / float(C * s_valid)
        if needs_mask:
            lane = jax.lax.broadcasted_iota(jnp.int32, (1, s_pad), 1)
            mask = lane < s_valid
        else:
            mask = None

        g1 = g1_ref[...]; be1 = be1_ref[...]
        w1 = w1_ref[...]; b1 = b1_ref[...]
        w2 = w2_ref[...]; b2 = b2_ref[...]
        caw = caw_ref[...]; cab = cab_ref[...]
        w3 = w3_ref[...]; b3 = b3_ref[...]
        g2 = g2_ref[...]; be2 = be2_ref[...]
        w45 = w45_ref[...]; b45 = b45_ref[...]
        w6 = w6_ref[...]; b6 = b6_ref[...]

        # Short unrolled loop over the nb samples packed into this grid step:
        # amortizes per-grid-step pipeline overhead without changing the
        # per-sample math.
        for i in range(nb):
            x = x_ref[i]                                               # (C, S)

            # ---------------- glfb_layer_1 ----------------
            h = layer_norm(x, g1, be1, inv_n, mask)
            h = jnp.dot(w1, h, preferred_element_type=jnp.float32) + b1   # (2C,S)
            h = jnp.dot(w2, h, preferred_element_type=jnp.float32) + b2   # (C, S)
            h = jax.nn.sigmoid(h)
            # ChannelAttention: by linearity caw @ mean_s(h) == mean_s(caw @ h),
            # so keep the MXU op lane-dense (full (C,S) matmul + lane reduce)
            # instead of a degenerate 1-lane-wide matvec.
            z = jnp.dot(caw, h, preferred_element_type=jnp.float32)       # (C, S)
            if mask is not None:
                z = jnp.where(mask, z, 0.0)
            att = jnp.sum(z, axis=1, keepdims=True) * inv_s + cab         # (C, 1)
            h = h * att
            l1 = jnp.dot(w3, h, preferred_element_type=jnp.float32) + b3  # (C, S)
            y = l1 + x

            # ---------------- glfb_layer_2 ----------------
            g = layer_norm(y, g2, be2, inv_n, mask)
            g = jnp.dot(w45, g, preferred_element_type=jnp.float32) + b45  # (C, S)
            g = jax.nn.sigmoid(g)
            l2 = jnp.dot(w6, g, preferred_element_type=jnp.float32) + b6   # (C, S)

            o_ref[i] = (l2 + y).astype(o_ref.dtype)

    return kernel


def _pick_samples_per_step(n, c, s, itemsize=4):
    """How many samples to pack per grid step (amortize per-step overhead)."""
    max_block_bytes = 2 * 1024 * 1024            # per-stream activation block
    cap = max(1, min(8, max_block_bytes // max(1, c * s * itemsize)))
    nb = 1
    for d in range(1, min(n, cap) + 1):
        if n % d == 0:
            nb = d
    return nb


def _vmem_limit_bytes(need):
    """Per-generation VMEM cap: ~85% of physical VMEM per TensorCore."""
    try:
        cap = int(pltpu.get_tpu_info().vmem_capacity_bytes)
    except Exception:
        cap = 64 * 1024 * 1024                   # conservative fallback
    cap = int(cap * 0.85)                        # headroom for compiler scratch
    return int(min(max(int(need * 1.3), 32 * 1024 * 1024), cap))


def glfb_forward(x_nchw, params):
    """x_nchw: (N, C, F, T) float32. Returns (N, C, F, T)."""
    N, C, F, T = x_nchw.shape
    S_valid = F * T
    # Keep the lane (last) dim a multiple of 128 so loads/stores stay
    # lane-dense (no masked vst); slice the padding off afterwards.
    S = ((S_valid + 127) // 128) * 128
    x = x_nchw.reshape(N, C, S_valid)
    p = params

    def pad_s(a):
        if S == S_valid:
            return a
        return jnp.pad(a, [(0, 0)] * (a.ndim - 1) + [(0, S - S_valid)])

    x = pad_s(x)

    # ---- exact algebraic folds done once outside the kernel ----
    # depthwise 1x1 (per-channel scale+bias) folded into the first conv:
    w1f = p["dw"] * p["w1"]                       # (2C, C)
    b1f = p["dw"] * p["b1"] + p["db"]             # (2C, 1)
    # layer-2 back-to-back 1x1 convs fused (Sigmoid only comes after both):
    w45 = p["w5"] @ p["w4"]                       # (C, C)
    b45 = p["w5"] @ p["b4"] + p["b5"]             # (C, 1)

    ordered = [
        pad_s(p["g1"]), pad_s(p["be1"]),
        w1f, b1f,
        p["w2"], p["b2"],
        p["caw"], p["cab"],
        p["w3"], p["b3"],
        pad_s(p["g2"]), pad_s(p["be2"]),
        w45, b45,
        p["w6"], p["b6"],
    ]

    Nb = _pick_samples_per_step(N, C, S)
    grid = (N // Nb,)
    kernel = _make_glfb_kernel(Nb, S_valid, S)

    # VMEM footprint: double-buffered x/o streams + single-buffered params
    # + live f32 intermediates of the unrolled per-sample loop.
    itemsize = 4
    act_block = Nb * C * S * itemsize
    param_bytes = sum(int(a.size) * itemsize for a in ordered)
    need = (2 * act_block) + (2 * act_block) + param_bytes + 8 * C * S * itemsize * Nb
    vmem_limit = _vmem_limit_bytes(need)

    def build(single_buffer_params):
        def io_spec():
            return pl.BlockSpec((Nb, C, S), lambda n: (n, 0, 0))

        def const_spec(shape):
            idx = lambda n: (0,) * len(shape)
            if single_buffer_params:
                # Grid-invariant weights/affines: one VMEM buffer is enough
                # (their DMA is already skipped after step 0).
                return pl.BlockSpec(shape, idx, pipeline_mode=pl.Buffered(1))
            return pl.BlockSpec(shape, idx)

        in_specs = [io_spec()] + [const_spec(tuple(a.shape)) for a in ordered]

        return pl.pallas_call(
            kernel,
            out_shape=jax.ShapeDtypeStruct((N, C, S), jnp.float32),
            grid_spec=pltpu.PrefetchScalarGridSpec(
                num_scalar_prefetch=0,
                grid=grid,
                in_specs=in_specs,
                out_specs=io_spec(),
            ),
            compiler_params=pltpu.CompilerParams(
                dimension_semantics=("parallel",),
                vmem_limit_bytes=vmem_limit),
        )

    try:
        out = build(single_buffer_params=True)(x, *ordered)
    except Exception:
        # Fallback if this JAX build rejects pipeline_mode=Buffered(1) on the
        # grid-invariant inputs; semantics are identical either way.
        out = build(single_buffer_params=False)(x, *ordered)

    if S != S_valid:
        out = out[..., :S_valid]
    return out.reshape(N, C, F, T)


def make_params(key, C, F, T):
    """Deterministic synthetic parameters matching the PyTorch module shapes."""
    S = F * T
    ks = jax.random.split(key, 16)

    def w(k, shape, scale=0.1):
        return (scale * jax.random.normal(k, shape)).astype(jnp.float32)

    params = {
        # LayerNorm((C, F, T)) affine params, flattened to (C, S)
        "g1": jnp.ones((C, S), jnp.float32) + w(ks[0], (C, S), 0.01),
        "be1": w(ks[1], (C, S), 0.01),
        # Conv2d(C, 2C, 1)
        "w1": w(ks[2], (2 * C, C)), "b1": w(ks[3], (2 * C, 1)),
        # Conv2d(2C, 2C, 1, groups=2C): weight (2C,1,1,1) -> per-channel scale
        "dw": w(ks[4], (2 * C, 1)), "db": w(ks[5], (2 * C, 1)),
        # Conv2d(2C, C, 1)
        "w2": w(ks[6], (C, 2 * C)), "b2": w(ks[7], (C, 1)),
        # ChannelAttention 1x1 conv (C -> C)
        "caw": w(ks[8], (C, C)), "cab": w(ks[9], (C, 1)),
        # Conv2d(C, C, 1)
        "w3": w(ks[10], (C, C)), "b3": w(ks[11], (C, 1)),
        # layer 2
        "g2": jnp.ones((C, S), jnp.float32) + w(ks[12], (C, S), 0.01),
        "be2": w(ks[13], (C, S), 0.01),
        "w4": w(ks[14], (2 * C, C)), "b4": jnp.zeros((2 * C, 1), jnp.float32),
        "w5": w(ks[15], (C, 2 * C)), "b5": jnp.zeros((C, 1), jnp.float32),
        "w6": jnp.eye(C, dtype=jnp.float32) * 0.5, "b6": jnp.zeros((C, 1), jnp.float32),
    }
    return params


def glfb_reference(x_nchw, params):
    """Pure-JAX reference mirroring the PyTorch forward (unfused params)."""
    N, C, F, T = x_nchw.shape
    S = F * T
    x = x_nchw.reshape(N, C, S)
    p = params

    def ln(v, g, b):
        mu = jnp.mean(v, axis=(1, 2), keepdims=True)
        var = jnp.mean((v - mu) ** 2, axis=(1, 2), keepdims=True)
        return (v - mu) / jnp.sqrt(var + EPS) * g[None] + b[None]

    def conv1x1(v, w, b):
        return jnp.einsum("oc,ncs->nos", w, v) + b[None]

    h = ln(x, p["g1"], p["be1"])
    h = conv1x1(h, p["w1"], p["b1"])
    h = p["dw"][None] * h + p["db"][None]
    h = conv1x1(h, p["w2"], p["b2"])
    h = jax.nn.sigmoid(h)
    pooled = jnp.mean(h, axis=2, keepdims=True)
    att = jnp.einsum("oc,ncs->nos", p["caw"], pooled) + p["cab"][None]
    h = h * att
    l1 = conv1x1(h, p["w3"], p["b3"])
    y = l1 + x

    g = ln(y, p["g2"], p["be2"])
    g = conv1x1(g, p["w4"], p["b4"])
    g = conv1x1(g, p["w5"], p["b5"])
    g = jax.nn.sigmoid(g)
    l2 = conv1x1(g, p["w6"], p["b6"])
    return (l2 + y).reshape(N, C, F, T)


if __name__ == "__main__":
    N, C, F, T = 2, 4, 16, 16  # batch, in_channels, frame_size, n_frames
    key = jax.random.PRNGKey(0)
    kx, kp = jax.random.split(key)
    x = jax.random.normal(kx, (N, C, F, T), dtype=jnp.float32)
    params = make_params(kp, C, F, T)

    out = glfb_forward(x, params)
    out = jax.block_until_ready(out)

    ref = jax.block_until_ready(glfb_reference(x, params))
    assert out.shape == (N, C, F, T)
    assert jnp.allclose(out, ref, rtol=1e-4, atol=5e-5), "mismatch vs JAX reference"

    print("KERNEL_OK")
</pallas_src>

<mosaic_0001>
module attributes {stable_mosaic.version = 11 : i64} {
  func.func @kernel(%arg0: i32, %arg1: memref<2x4x256xf32, #tpu.memory_space<vmem>>, %arg2: memref<4x256xf32, #tpu.memory_space<vmem>>, %arg3: memref<4x256xf32, #tpu.memory_space<vmem>>, %arg4: memref<8x4xf32, #tpu.memory_space<vmem>>, %arg5: memref<8x1xf32, #tpu.memory_space<vmem>>, %arg6: memref<4x8xf32, #tpu.memory_space<vmem>>, %arg7: memref<4x1xf32, #tpu.memory_space<vmem>>, %arg8: memref<4x4xf32, #tpu.memory_space<vmem>>, %arg9: memref<4x1xf32, #tpu.memory_space<vmem>>, %arg10: memref<4x4xf32, #tpu.memory_space<vmem>>, %arg11: memref<4x1xf32, #tpu.memory_space<vmem>>, %arg12: memref<4x256xf32, #tpu.memory_space<vmem>>, %arg13: memref<4x256xf32, #tpu.memory_space<vmem>>, %arg14: memref<4x4xf32, #tpu.memory_space<vmem>>, %arg15: memref<4x1xf32, #tpu.memory_space<vmem>>, %arg16: memref<4x4xf32, #tpu.memory_space<vmem>>, %arg17: memref<4x1xf32, #tpu.memory_space<vmem>>, %arg18: memref<2x4x256xf32, #tpu.memory_space<vmem>>) attributes {dimension_semantics = [#tpu.dimension_semantics<parallel>], iteration_bounds = array<i64: 1>, scalar_prefetch = 0 : i64, scratch_operands = 0 : i64, tpu.core_type = #tpu.core_type<tc>, window_params = [{transform_indices = @transform_0, window_bounds = array<i64: 2, 4, 256>}, {pipeline_mode = #tpu.pipeline_mode<synchronous>, transform_indices = @transform_1, window_bounds = array<i64: 4, 256>}, {pipeline_mode = #tpu.pipeline_mode<synchronous>, transform_indices = @transform_2, window_bounds = array<i64: 4, 256>}, {pipeline_mode = #tpu.pipeline_mode<synchronous>, transform_indices = @transform_3, window_bounds = array<i64: 8, 4>}, {pipeline_mode = #tpu.pipeline_mode<synchronous>, transform_indices = @transform_4, window_bounds = array<i64: 8, 1>}, {pipeline_mode = #tpu.pipeline_mode<synchronous>, transform_indices = @transform_5, window_bounds = array<i64: 4, 8>}, {pipeline_mode = #tpu.pipeline_mode<synchronous>, transform_indices = @transform_6, window_bounds = array<i64: 4, 1>}, {pipeline_mode = #tpu.pipeline_mode<synchronous>, transform_indices = @transform_7, window_bounds = array<i64: 4, 4>}, {pipeline_mode = #tpu.pipeline_mode<synchronous>, transform_indices = @transform_8, window_bounds = array<i64: 4, 1>}, {pipeline_mode = #tpu.pipeline_mode<synchronous>, transform_indices = @transform_9, window_bounds = array<i64: 4, 4>}, {pipeline_mode = #tpu.pipeline_mode<synchronous>, transform_indices = @transform_10, window_bounds = array<i64: 4, 1>}, {pipeline_mode = #tpu.pipeline_mode<synchronous>, transform_indices = @transform_11, window_bounds = array<i64: 4, 256>}, {pipeline_mode = #tpu.pipeline_mode<synchronous>, transform_indices = @transform_12, window_bounds = array<i64: 4, 256>}, {pipeline_mode = #tpu.pipeline_mode<synchronous>, transform_indices = @transform_13, window_bounds = array<i64: 4, 4>}, {pipeline_mode = #tpu.pipeline_mode<synchronous>, transform_indices = @transform_14, window_bounds = array<i64: 4, 1>}, {pipeline_mode = #tpu.pipeline_mode<synchronous>, transform_indices = @transform_15, window_bounds = array<i64: 4, 4>}, {pipeline_mode = #tpu.pipeline_mode<synchronous>, transform_indices = @transform_16, window_bounds = array<i64: 4, 1>}, {transform_indices = @transform_17, window_bounds = array<i64: 2, 4, 256>}]} {
    %c0 = arith.constant 0 : index
    %c0_0 = arith.constant 0 : index
    %0 = vector.load %arg2[%c0, %c0_0] : memref<4x256xf32, #tpu.memory_space<vmem>>, vector<4x256xf32>
    %c0_1 = arith.constant 0 : index
    %c0_2 = arith.constant 0 : index
    %1 = vector.load %arg3[%c0_1, %c0_2] : memref<4x256xf32, #tpu.memory_space<vmem>>, vector<4x256xf32>
    %c0_3 = arith.constant 0 : index
    %c0_4 = arith.constant 0 : index
    %2 = vector.load %arg4[%c0_3, %c0_4] : memref<8x4xf32, #tpu.memory_space<vmem>>, vector<8x4xf32>
    %c0_5 = arith.constant 0 : index
    %c0_6 = arith.constant 0 : index
    %3 = vector.load %arg5[%c0_5, %c0_6] : memref<8x1xf32, #tpu.memory_space<vmem>>, vector<8x1xf32>
    %c0_7 = arith.constant 0 : index
    %c0_8 = arith.constant 0 : index
    %4 = vector.load %arg6[%c0_7, %c0_8] : memref<4x8xf32, #tpu.memory_space<vmem>>, vector<4x8xf32>
    %c0_9 = arith.constant 0 : index
    %c0_10 = arith.constant 0 : index
    %5 = vector.load %arg7[%c0_9, %c0_10] : memref<4x1xf32, #tpu.memory_space<vmem>>, vector<4x1xf32>
    %c0_11 = arith.constant 0 : index
    %c0_12 = arith.constant 0 : index
    %6 = vector.load %arg8[%c0_11, %c0_12] : memref<4x4xf32, #tpu.memory_space<vmem>>, vector<4x4xf32>
    %c0_13 = arith.constant 0 : index
    %c0_14 = arith.constant 0 : index
    %7 = vector.load %arg9[%c0_13, %c0_14] : memref<4x1xf32, #tpu.memory_space<vmem>>, vector<4x1xf32>
    %c0_15 = arith.constant 0 : index
    %c0_16 = arith.constant 0 : index
    %8 = vector.load %arg10[%c0_15, %c0_16] : memref<4x4xf32, #tpu.memory_space<vmem>>, vector<4x4xf32>
    %c0_17 = arith.constant 0 : index
    %c0_18 = arith.constant 0 : index
    %9 = vector.load %arg11[%c0_17, %c0_18] : memref<4x1xf32, #tpu.memory_space<vmem>>, vector<4x1xf32>
    %c0_19 = arith.constant 0 : index
    %c0_20 = arith.constant 0 : index
    %10 = vector.load %arg12[%c0_19, %c0_20] : memref<4x256xf32, #tpu.memory_space<vmem>>, vector<4x256xf32>
    %c0_21 = arith.constant 0 : index
    %c0_22 = arith.constant 0 : index
    %11 = vector.load %arg13[%c0_21, %c0_22] : memref<4x256xf32, #tpu.memory_space<vmem>>, vector<4x256xf32>
    %c0_23 = arith.constant 0 : index
    %c0_24 = arith.constant 0 : index
    %12 = vector.load %arg14[%c0_23, %c0_24] : memref<4x4xf32, #tpu.memory_space<vmem>>, vector<4x4xf32>
    %c0_25 = arith.constant 0 : index
    %c0_26 = arith.constant 0 : index
    %13 = vector.load %arg15[%c0_25, %c0_26] : memref<4x1xf32, #tpu.memory_space<vmem>>, vector<4x1xf32>
    %c0_27 = arith.constant 0 : index
    %c0_28 = arith.constant 0 : index
    %14 = vector.load %arg16[%c0_27, %c0_28] : memref<4x4xf32, #tpu.memory_space<vmem>>, vector<4x4xf32>
    %c0_29 = arith.constant 0 : index
    %c0_30 = arith.constant 0 : index
    %15 = vector.load %arg17[%c0_29, %c0_30] : memref<4x1xf32, #tpu.memory_space<vmem>>, vector<4x1xf32>
    %c0_31 = arith.constant 0 : index
    %c0_32 = arith.constant 0 : index
    %c0_33 = arith.constant 0 : index
    %16 = vector.load %arg1[%c0_31, %c0_32, %c0_33] : memref<2x4x256xf32, #tpu.memory_space<vmem>>, vector<1x4x256xf32>
    %17 = vector.shape_cast %16 : vector<1x4x256xf32> to vector<4x256xf32>
    %18 = vector.shape_cast %17 : vector<4x256xf32> to vector<1x4x256xf32>
    %cst = arith.constant dense<0.000000e+00> : vector<1xf32>
    %19 = vector.multi_reduction <add>, %18, %cst [1, 2] : vector<1x4x256xf32> to vector<1xf32>
    %20 = vector.shape_cast %19 : vector<1xf32> to vector<1x1x1xf32>
    %21 = vector.extract %20[0, 0, 0] : f32 from vector<1x1x1xf32>
    %cst_34 = arith.constant 9.765625E-4 : f32
    %22 = arith.mulf %21, %cst_34 : f32
    %23 = vector.broadcast %22 : f32 to vector<4x256xf32>
    %24 = arith.subf %17, %23 : vector<4x256xf32>
    %25 = arith.mulf %24, %24 : vector<4x256xf32>
    %26 = vector.shape_cast %25 : vector<4x256xf32> to vector<1x4x256xf32>
    %cst_35 = arith.constant dense<0.000000e+00> : vector<1xf32>
    %27 = vector.multi_reduction <add>, %26, %cst_35 [1, 2] : vector<1x4x256xf32> to vector<1xf32>
    %28 = vector.shape_cast %27 : vector<1xf32> to vector<1x1x1xf32>
    %29 = vector.extract %28[0, 0, 0] : f32 from vector<1x1x1xf32>
    %cst_36 = arith.constant 9.765625E-4 : f32
    %30 = arith.mulf %29, %cst_36 : f32
    %cst_37 = arith.constant 9.99999974E-6 : f32
    %31 = arith.addf %30, %cst_37 : f32
    %32 = math.rsqrt %31 : f32
    %33 = vector.broadcast %32 : f32 to vector<4x256xf32>
    %34 = arith.mulf %24, %33 : vector<4x256xf32>
    %35 = arith.mulf %34, %0 : vector<4x256xf32>
    %36 = arith.addf %35, %1 : vector<4x256xf32>
    %cst_38 = arith.constant dense<0.000000e+00> : vector<8x256xf32>
    %37 = tpu.matmul %2, %36, %cst_38 {dimension_numbers = #tpu.dot_dimension_numbers<[1], [0], [0], [1], [0, 0, 1, 1], [], []>} : vector<8x4xf32>, vector<4x256xf32>, vector<8x256xf32> -> vector<8x256xf32>
    %38 = vector.broadcast %3 : vector<8x1xf32> to vector<8x256xf32>
    %39 = arith.addf %37, %38 : vector<8x256xf32>
    %cst_39 = arith.constant dense<0.000000e+00> : vector<4x256xf32>
    %40 = tpu.matmul %4, %39, %cst_39 {dimension_numbers = #tpu.dot_dimension_numbers<[1], [0], [0], [1], [0, 0, 1, 1], [], []>} : vector<4x8xf32>, vector<8x256xf32>, vector<4x256xf32> -> vector<4x256xf32>
    %41 = vector.broadcast %5 : vector<4x1xf32> to vector<4x256xf32>
    %42 = arith.addf %40, %41 : vector<4x256xf32>
    %43 = arith.negf %42 : vector<4x256xf32>
    %44 = math.exp %43 : vector<4x256xf32>
    %cst_40 = arith.constant 1.000000e+00 : f32
    %45 = vector.broadcast %cst_40 : f32 to vector<4x256xf32>
    %46 = arith.addf %45, %44 : vector<4x256xf32>
    %47 = arith.divf %45, %46 : vector<4x256xf32>
    %cst_41 = arith.constant dense<0.000000e+00> : vector<4x256xf32>
    %48 = tpu.matmul %6, %47, %cst_41 {dimension_numbers = #tpu.dot_dimension_numbers<[1], [0], [0], [1], [0, 0, 1, 1], [], []>} : vector<4x4xf32>, vector<4x256xf32>, vector<4x256xf32> -> vector<4x256xf32>
    %cst_42 = arith.constant dense<0.000000e+00> : vector<4xf32>
    %49 = vector.multi_reduction <add>, %48, %cst_42 [1] : vector<4x256xf32> to vector<4xf32>
    %50 = vector.shape_cast %49 : vector<4xf32> to vector<4x1xf32>
    %cst_43 = arith.constant 3.906250e-03 : f32
    %51 = vector.broadcast %cst_43 : f32 to vector<4x1xf32>
    %52 = arith.mulf %50, %51 : vector<4x1xf32>
    %53 = arith.addf %52, %7 : vector<4x1xf32>
    %54 = vector.broadcast %53 : vector<4x1xf32> to vector<4x256xf32>
    %55 = arith.mulf %47, %54 : vector<4x256xf32>
    %cst_44 = arith.constant dense<0.000000e+00> : vector<4x256xf32>
    %56 = tpu.matmul %8, %55, %cst_44 {dimension_numbers = #tpu.dot_dimension_numbers<[1], [0], [0], [1], [0, 0, 1, 1], [], []>} : vector<4x4xf32>, vector<4x256xf32>, vector<4x256xf32> -> vector<4x256xf32>
    %57 = vector.broadcast %9 : vector<4x1xf32> to vector<4x256xf32>
    %58 = arith.addf %56, %57 : vector<4x256xf32>
    %59 = arith.addf %58, %17 : vector<4x256xf32>
    %60 = vector.shape_cast %59 : vector<4x256xf32> to vector<1x4x256xf32>
    %cst_45 = arith.constant dense<0.000000e+00> : vector<1xf32>
    %61 = vector.multi_reduction <add>, %60, %cst_45 [1, 2] : vector<1x4x256xf32> to vector<1xf32>
    %62 = vector.shape_cast %61 : vector<1xf32> to vector<1x1x1xf32>
    %63 = vector.extract %62[0, 0, 0] : f32 from vector<1x1x1xf32>
    %cst_46 = arith.constant 9.765625E-4 : f32
    %64 = arith.mulf %63, %cst_46 : f32
    %65 = vector.broadcast %64 : f32 to vector<4x256xf32>
    %66 = arith.subf %59, %65 : vector<4x256xf32>
    %67 = arith.mulf %66, %66 : vector<4x256xf32>
    %68 = vector.shape_cast %67 : vector<4x256xf32> to vector<1x4x256xf32>
    %cst_47 = arith.constant dense<0.000000e+00> : vector<1xf32>
    %69 = vector.multi_reduction <add>, %68, %cst_47 [1, 2] : vector<1x4x256xf32> to vector<1xf32>
    %70 = vector.shape_cast %69 : vector<1xf32> to vector<1x1x1xf32>
    %71 = vector.extract %70[0, 0, 0] : f32 from vector<1x1x1xf32>
    %cst_48 = arith.constant 9.765625E-4 : f32
    %72 = arith.mulf %71, %cst_48 : f32
    %cst_49 = arith.constant 9.99999974E-6 : f32
    %73 = arith.addf %72, %cst_49 : f32
    %74 = math.rsqrt %73 : f32
    %75 = vector.broadcast %74 : f32 to vector<4x256xf32>
    %76 = arith.mulf %66, %75 : vector<4x256xf32>
    %77 = arith.mulf %76, %10 : vector<4x256xf32>
    %78 = arith.addf %77, %11 : vector<4x256xf32>
    %cst_50 = arith.constant dense<0.000000e+00> : vector<4x256xf32>
    %79 = tpu.matmul %12, %78, %cst_50 {dimension_numbers = #tpu.dot_dimension_numbers<[1], [0], [0], [1], [0, 0, 1, 1], [], []>} : vector<4x4xf32>, vector<4x256xf32>, vector<4x256xf32> -> vector<4x256xf32>
    %80 = vector.broadcast %13 : vector<4x1xf32> to vector<4x256xf32>
    %81 = arith.addf %79, %80 : vector<4x256xf32>
    %82 = arith.negf %81 : vector<4x256xf32>
    %83 = math.exp %82 : vector<4x256xf32>
    %cst_51 = arith.constant 1.000000e+00 : f32
    %84 = vector.broadcast %cst_51 : f32 to vector<4x256xf32>
    %85 = arith.addf %84, %83 : vector<4x256xf32>
    %86 = arith.divf %84, %85 : vector<4x256xf32>
    %cst_52 = arith.constant dense<0.000000e+00> : vector<4x256xf32>
    %87 = tpu.matmul %14, %86, %cst_52 {dimension_numbers = #tpu.dot_dimension_numbers<[1], [0], [0], [1], [0, 0, 1, 1], [], []>} : vector<4x4xf32>, vector<4x256xf32>, vector<4x256xf32> -> vector<4x256xf32>
    %88 = vector.broadcast %15 : vector<4x1xf32> to vector<4x256xf32>
    %89 = arith.addf %87, %88 : vector<4x256xf32>
    %90 = arith.addf %89, %59 : vector<4x256xf32>
    %c0_53 = arith.constant 0 : index
    %c0_54 = arith.constant 0 : index
    %c0_55 = arith.constant 0 : index
    %91 = vector.load %arg18[%c0_53, %c0_54, %c0_55] : memref<2x4x256xf32, #tpu.memory_space<vmem>>, vector<1x4x256xf32>
    %92 = vector.shape_cast %91 : vector<1x4x256xf32> to vector<4x256xf32>
    %93 = vector.shape_cast %90 : vector<4x256xf32> to vector<1x4x256xf32>
    tpu.vector_store %arg18[%c0_53, %c0_54, %c0_55], %93 {strides = array<i32>} : memref<2x4x256xf32, #tpu.memory_space<vmem>>, vector<1x4x256xf32>,
    %c1 = arith.constant 1 : index
    %c0_56 = arith.constant 0 : index
    %c0_57 = arith.constant 0 : index
    %94 = vector.load %arg1[%c1, %c0_56, %c0_57] : memref<2x4x256xf32, #tpu.memory_space<vmem>>, vector<1x4x256xf32>
    %95 = vector.shape_cast %94 : vector<1x4x256xf32> to vector<4x256xf32>
    %96 = vector.shape_cast %95 : vector<4x256xf32> to vector<1x4x256xf32>
    %cst_58 = arith.constant dense<0.000000e+00> : vector<1xf32>
    %97 = vector.multi_reduction <add>, %96, %cst_58 [1, 2] : vector<1x4x256xf32> to vector<1xf32>
    %98 = vector.shape_cast %97 : vector<1xf32> to vector<1x1x1xf32>
    %99 = vector.extract %98[0, 0, 0] : f32 from vector<1x1x1xf32>
    %cst_59 = arith.constant 9.765625E-4 : f32
    %100 = arith.mulf %99, %cst_59 : f32
    %101 = vector.broadcast %100 : f32 to vector<4x256xf32>
    %102 = arith.subf %95, %101 : vector<4x256xf32>
    %103 = arith.mulf %102, %102 : vector<4x256xf32>
    %104 = vector.shape_cast %103 : vector<4x256xf32> to vector<1x4x256xf32>
    %cst_60 = arith.constant dense<0.000000e+00> : vector<1xf32>
    %105 = vector.multi_reduction <add>, %104, %cst_60 [1, 2] : vector<1x4x256xf32> to vector<1xf32>
    %106 = vector.shape_cast %105 : vector<1xf32> to vector<1x1x1xf32>
    %107 = vector.extract %106[0, 0, 0] : f32 from vector<1x1x1xf32>
    %cst_61 = arith.constant 9.765625E-4 : f32
    %108 = arith.mulf %107, %cst_61 : f32
    %cst_62 = arith.constant 9.99999974E-6 : f32
    %109 = arith.addf %108, %cst_62 : f32
    %110 = math.rsqrt %109 : f32
    %111 = vector.broadcast %110 : f32 to vector<4x256xf32>
    %112 = arith.mulf %102, %111 : vector<4x256xf32>
    %113 = arith.mulf %112, %0 : vector<4x256xf32>
    %114 = arith.addf %113, %1 : vector<4x256xf32>
    %cst_63 = arith.constant dense<0.000000e+00> : vector<8x256xf32>
    %115 = tpu.matmul %2, %114, %cst_63 {dimension_numbers = #tpu.dot_dimension_numbers<[1], [0], [0], [1], [0, 0, 1, 1], [], []>} : vector<8x4xf32>, vector<4x256xf32>, vector<8x256xf32> -> vector<8x256xf32>
    %116 = vector.broadcast %3 : vector<8x1xf32> to vector<8x256xf32>
    %117 = arith.addf %115, %116 : vector<8x256xf32>
    %cst_64 = arith.constant dense<0.000000e+00> : vector<4x256xf32>
    %118 = tpu.matmul %4, %117, %cst_64 {dimension_numbers = #tpu.dot_dimension_numbers<[1], [0], [0], [1], [0, 0, 1, 1], [], []>} : vector<4x8xf32>, vector<8x256xf32>, vector<4x256xf32> -> vector<4x256xf32>
    %119 = vector.broadcast %5 : vector<4x1xf32> to vector<4x256xf32>
    %120 = arith.addf %118, %119 : vector<4x256xf32>
    %121 = arith.negf %120 : vector<4x256xf32>
    %122 = math.exp %121 : vector<4x256xf32>
    %cst_65 = arith.constant 1.000000e+00 : f32
    %123 = vector.broadcast %cst_65 : f32 to vector<4x256xf32>
    %124 = arith.addf %123, %122 : vector<4x256xf32>
    %125 = arith.divf %123, %124 : vector<4x256xf32>
    %cst_66 = arith.constant dense<0.000000e+00> : vector<4x256xf32>
    %126 = tpu.matmul %6, %125, %cst_66 {dimension_numbers = #tpu.dot_dimension_numbers<[1], [0], [0], [1], [0, 0, 1, 1], [], []>} : vector<4x4xf32>, vector<4x256xf32>, vector<4x256xf32> -> vector<4x256xf32>
    %cst_67 = arith.constant dense<0.000000e+00> : vector<4xf32>
    %127 = vector.multi_reduction <add>, %126, %cst_67 [1] : vector<4x256xf32> to vector<4xf32>
    %128 = vector.shape_cast %127 : vector<4xf32> to vector<4x1xf32>
    %cst_68 = arith.constant 3.906250e-03 : f32
    %129 = vector.broadcast %cst_68 : f32 to vector<4x1xf32>
    %130 = arith.mulf %128, %129 : vector<4x1xf32>
    %131 = arith.addf %130, %7 : vector<4x1xf32>
    %132 = vector.broadcast %131 : vector<4x1xf32> to vector<4x256xf32>
    %133 = arith.mulf %125, %132 : vector<4x256xf32>
    %cst_69 = arith.constant dense<0.000000e+00> : vector<4x256xf32>
    %134 = tpu.matmul %8, %133, %cst_69 {dimension_numbers = #tpu.dot_dimension_numbers<[1], [0], [0], [1], [0, 0, 1, 1], [], []>} : vector<4x4xf32>, vector<4x256xf32>, vector<4x256xf32> -> vector<4x256xf32>
    %135 = vector.broadcast %9 : vector<4x1xf32> to vector<4x256xf32>
    %136 = arith.addf %134, %135 : vector<4x256xf32>
    %137 = arith.addf %136, %95 : vector<4x256xf32>
    %138 = vector.shape_cast %137 : vector<4x256xf32> to vector<1x4x256xf32>
    %cst_70 = arith.constant dense<0.000000e+00> : vector<1xf32>
    %139 = vector.multi_reduction <add>, %138, %cst_70 [1, 2] : vector<1x4x256xf32> to vector<1xf32>
    %140 = vector.shape_cast %139 : vector<1xf32> to vector<1x1x1xf32>
    %141 = vector.extract %140[0, 0, 0] : f32 from vector<1x1x1xf32>
    %cst_71 = arith.constant 9.765625E-4 : f32
    %142 = arith.mulf %141, %cst_71 : f32
    %143 = vector.broadcast %142 : f32 to vector<4x256xf32>
    %144 = arith.subf %137, %143 : vector<4x256xf32>
    %145 = arith.mulf %144, %144 : vector<4x256xf32>
    %146 = vector.shape_cast %145 : vector<4x256xf32> to vector<1x4x256xf32>
    %cst_72 = arith.constant dense<0.000000e+00> : vector<1xf32>
    %147 = vector.multi_reduction <add>, %146, %cst_72 [1, 2] : vector<1x4x256xf32> to vector<1xf32>
    %148 = vector.shape_cast %147 : vector<1xf32> to vector<1x1x1xf32>
    %149 = vector.extract %148[0, 0, 0] : f32 from vector<1x1x1xf32>
    %cst_73 = arith.constant 9.765625E-4 : f32
    %150 = arith.mulf %149, %cst_73 : f32
    %cst_74 = arith.constant 9.99999974E-6 : f32
    %151 = arith.addf %150, %cst_74 : f32
    %152 = math.rsqrt %151 : f32
    %153 = vector.broadcast %152 : f32 to vector<4x256xf32>
    %154 = arith.mulf %144, %153 : vector<4x256xf32>
    %155 = arith.mulf %154, %10 : vector<4x256xf32>
    %156 = arith.addf %155, %11 : vector<4x256xf32>
    %cst_75 = arith.constant dense<0.000000e+00> : vector<4x256xf32>
    %157 = tpu.matmul %12, %156, %cst_75 {dimension_numbers = #tpu.dot_dimension_numbers<[1], [0], [0], [1], [0, 0, 1, 1], [], []>} : vector<4x4xf32>, vector<4x256xf32>, vector<4x256xf32> -> vector<4x256xf32>
    %158 = vector.broadcast %13 : vector<4x1xf32> to vector<4x256xf32>
    %159 = arith.addf %157, %158 : vector<4x256xf32>
    %160 = arith.negf %159 : vector<4x256xf32>
    %161 = math.exp %160 : vector<4x256xf32>
    %cst_76 = arith.constant 1.000000e+00 : f32
    %162 = vector.broadcast %cst_76 : f32 to vector<4x256xf32>
    %163 = arith.addf %162, %161 : vector<4x256xf32>
    %164 = arith.divf %162, %163 : vector<4x256xf32>
    %cst_77 = arith.constant dense<0.000000e+00> : vector<4x256xf32>
    %165 = tpu.matmul %14, %164, %cst_77 {dimension_numbers = #tpu.dot_dimension_numbers<[1], [0], [0], [1], [0, 0, 1, 1], [], []>} : vector<4x4xf32>, vector<4x256xf32>, vector<4x256xf32> -> vector<4x256xf32>
    %166 = vector.broadcast %15 : vector<4x1xf32> to vector<4x256xf32>
    %167 = arith.addf %165, %166 : vector<4x256xf32>
    %168 = arith.addf %167, %137 : vector<4x256xf32>
    %c1_78 = arith.constant 1 : index
    %c0_79 = arith.constant 0 : index
    %c0_80 = arith.constant 0 : index
    %169 = vector.load %arg18[%c1_78, %c0_79, %c0_80] : memref<2x4x256xf32, #tpu.memory_space<vmem>>, vector<1x4x256xf32>
    %170 = vector.shape_cast %169 : vector<1x4x256xf32> to vector<4x256xf32>
    %171 = vector.shape_cast %168 : vector<4x256xf32> to vector<1x4x256xf32>
    tpu.vector_store %arg18[%c1_78, %c0_79, %c0_80], %171 {strides = array<i32>} : memref<2x4x256xf32, #tpu.memory_space<vmem>>, vector<1x4x256xf32>,
    return
  }
  func.func @transform_0(%arg0: i32) -> (i32, i32, i32) {
    %c0_i32 = arith.constant 0 : i32
    %c0_i32_0 = arith.constant 0 : i32
    %c0_i32_1 = arith.constant 0 : i32
    return %arg0, %c0_i32, %c0_i32_0 : i32, i32, i32
  }
  func.func @transform_1(%arg0: i32) -> (i32, i32) {
    %c0_i32 = arith.constant 0 : i32
    %c0_i32_0 = arith.constant 0 : i32
    %c0_i32_1 = arith.constant 0 : i32
    return %c0_i32, %c0_i32_0 : i32, i32
  }
  func.func @transform_2(%arg0: i32) -> (i32, i32) {
    %c0_i32 = arith.constant 0 : i32
    %c0_i32_0 = arith.constant 0 : i32
    %c0_i32_1 = arith.constant 0 : i32
    return %c0_i32, %c0_i32_0 : i32, i32
  }
  func.func @transform_3(%arg0: i32) -> (i32, i32) {
    %c0_i32 = arith.constant 0 : i32
    %c0_i32_0 = arith.constant 0 : i32
    %c0_i32_1 = arith.constant 0 : i32
    return %c0_i32, %c0_i32_0 : i32, i32
  }
  func.func @transform_4(%arg0: i32) -> (i32, i32) {
    %c0_i32 = arith.constant 0 : i32
    %c0_i32_0 = arith.constant 0 : i32
    %c0_i32_1 = arith.constant 0 : i32
    return %c0_i32, %c0_i32_0 : i32, i32
  }
  func.func @transform_5(%arg0: i32) -> (i32, i32) {
    %c0_i32 = arith.constant 0 : i32
    %c0_i32_0 = arith.constant 0 : i32
    %c0_i32_1 = arith.constant 0 : i32
    return %c0_i32, %c0_i32_0 : i32, i32
  }
  func.func @transform_6(%arg0: i32) -> (i32, i32) {
    %c0_i32 = arith.constant 0 : i32
    %c0_i32_0 = arith.constant 0 : i32
    %c0_i32_1 = arith.constant 0 : i32
    return %c0_i32, %c0_i32_0 : i32, i32
  }
  func.func @transform_7(%arg0: i32) -> (i32, i32) {
    %c0_i32 = arith.constant 0 : i32
    %c0_i32_0 = arith.constant 0 : i32
    %c0_i32_1 = arith.constant 0 : i32
    return %c0_i32, %c0_i32_0 : i32, i32
  }
  func.func @transform_8(%arg0: i32) -> (i32, i32) {
    %c0_i32 = arith.constant 0 : i32
    %c0_i32_0 = arith.constant 0 : i32
    %c0_i32_1 = arith.constant 0 : i32
    return %c0_i32, %c0_i32_0 : i32, i32
  }
  func.func @transform_9(%arg0: i32) -> (i32, i32) {
    %c0_i32 = arith.constant 0 : i32
    %c0_i32_0 = arith.constant 0 : i32
    %c0_i32_1 = arith.constant 0 : i32
    return %c0_i32, %c0_i32_0 : i32, i32
  }
  func.func @transform_10(%arg0: i32) -> (i32, i32) {
    %c0_i32 = arith.constant 0 : i32
    %c0_i32_0 = arith.constant 0 : i32
    %c0_i32_1 = arith.constant 0 : i32
    return %c0_i32, %c0_i32_0 : i32, i32
  }
  func.func @transform_11(%arg0: i32) -> (i32, i32) {
    %c0_i32 = arith.constant 0 : i32
    %c0_i32_0 = arith.constant 0 : i32
    %c0_i32_1 = arith.constant 0 : i32
    return %c0_i32, %c0_i32_0 : i32, i32
  }
  func.func @transform_12(%arg0: i32) -> (i32, i32) {
    %c0_i32 = arith.constant 0 : i32
    %c0_i32_0 = arith.constant 0 : i32
    %c0_i32_1 = arith.constant 0 : i32
    return %c0_i32, %c0_i32_0 : i32, i32
  }
  func.func @transform_13(%arg0: i32) -> (i32, i32) {
    %c0_i32 = arith.constant 0 : i32
    %c0_i32_0 = arith.constant 0 : i32
    %c0_i32_1 = arith.constant 0 : i32
    return %c0_i32, %c0_i32_0 : i32, i32
  }
  func.func @transform_14(%arg0: i32) -> (i32, i32) {
    %c0_i32 = arith.constant 0 : i32
    %c0_i32_0 = arith.constant 0 : i32
    %c0_i32_1 = arith.constant 0 : i32
    return %c0_i32, %c0_i32_0 : i32, i32
  }
  func.func @transform_15(%arg0: i32) -> (i32, i32) {
    %c0_i32 = arith.constant 0 : i32
    %c0_i32_0 = arith.constant 0 : i32
    %c0_i32_1 = arith.constant 0 : i32
    return %c0_i32, %c0_i32_0 : i32, i32
  }
  func.func @transform_16(%arg0: i32) -> (i32, i32) {
    %c0_i32 = arith.constant 0 : i32
    %c0_i32_0 = arith.constant 0 : i32
    %c0_i32_1 = arith.constant 0 : i32
    return %c0_i32, %c0_i32_0 : i32, i32
  }
  func.func @transform_17(%arg0: i32) -> (i32, i32, i32) {
    %c0_i32 = arith.constant 0 : i32
    %c0_i32_0 = arith.constant 0 : i32
    %c0_i32_1 = arith.constant 0 : i32
    return %arg0, %c0_i32, %c0_i32_0 : i32, i32, i32
  }
}

module attributes {stable_mosaic.version = 11 : i64} {
  func.func @kernel(%arg0: i32, %arg1: memref<2x4x256xf32, #tpu.memory_space<vmem>>, %arg2: memref<4x256xf32, #tpu.memory_space<vmem>>, %arg3: memref<4x256xf32, #tpu.memory_space<vmem>>, %arg4: memref<8x4xf32, #tpu.memory_space<vmem>>, %arg5: memref<8x1xf32, #tpu.memory_space<vmem>>, %arg6: memref<4x8xf32, #tpu.memory_space<vmem>>, %arg7: memref<4x1xf32, #tpu.memory_space<vmem>>, %arg8: memref<4x4xf32, #tpu.memory_space<vmem>>, %arg9: memref<4x1xf32, #tpu.memory_space<vmem>>, %arg10: memref<4x4xf32, #tpu.memory_space<vmem>>, %arg11: memref<4x1xf32, #tpu.memory_space<vmem>>, %arg12: memref<4x256xf32, #tpu.memory_space<vmem>>, %arg13: memref<4x256xf32, #tpu.memory_space<vmem>>, %arg14: memref<4x4xf32, #tpu.memory_space<vmem>>, %arg15: memref<4x1xf32, #tpu.memory_space<vmem>>, %arg16: memref<4x4xf32, #tpu.memory_space<vmem>>, %arg17: memref<4x1xf32, #tpu.memory_space<vmem>>, %arg18: memref<2x4x256xf32, #tpu.memory_space<vmem>>) attributes {dimension_semantics = [#tpu.dimension_semantics<parallel>], iteration_bounds = array<i64: 1>, scalar_prefetch = 0 : i64, scratch_operands = 0 : i64, tpu.core_type = #tpu.core_type<tc>, window_params = [{transform_indices = @transform_0, window_bounds = array<i64: 2, 4, 256>}, {pipeline_mode = #tpu.pipeline_mode<synchronous>, transform_indices = @transform_1, window_bounds = array<i64: 4, 256>}, {pipeline_mode = #tpu.pipeline_mode<synchronous>, transform_indices = @transform_2, window_bounds = array<i64: 4, 256>}, {pipeline_mode = #tpu.pipeline_mode<synchronous>, transform_indices = @transform_3, window_bounds = array<i64: 8, 4>}, {pipeline_mode = #tpu.pipeline_mode<synchronous>, transform_indices = @transform_4, window_bounds = array<i64: 8, 1>}, {pipeline_mode = #tpu.pipeline_mode<synchronous>, transform_indices = @transform_5, window_bounds = array<i64: 4, 8>}, {pipeline_mode = #tpu.pipeline_mode<synchronous>, transform_indices = @transform_6, window_bounds = array<i64: 4, 1>}, {pipeline_mode = #tpu.pipeline_mode<synchronous>, transform_indices = @transform_7, window_bounds = array<i64: 4, 4>}, {pipeline_mode = #tpu.pipeline_mode<synchronous>, transform_indices = @transform_8, window_bounds = array<i64: 4, 1>}, {pipeline_mode = #tpu.pipeline_mode<synchronous>, transform_indices = @transform_9, window_bounds = array<i64: 4, 4>}, {pipeline_mode = #tpu.pipeline_mode<synchronous>, transform_indices = @transform_10, window_bounds = array<i64: 4, 1>}, {pipeline_mode = #tpu.pipeline_mode<synchronous>, transform_indices = @transform_11, window_bounds = array<i64: 4, 256>}, {pipeline_mode = #tpu.pipeline_mode<synchronous>, transform_indices = @transform_12, window_bounds = array<i64: 4, 256>}, {pipeline_mode = #tpu.pipeline_mode<synchronous>, transform_indices = @transform_13, window_bounds = array<i64: 4, 4>}, {pipeline_mode = #tpu.pipeline_mode<synchronous>, transform_indices = @transform_14, window_bounds = array<i64: 4, 1>}, {pipeline_mode = #tpu.pipeline_mode<synchronous>, transform_indices = @transform_15, window_bounds = array<i64: 4, 4>}, {pipeline_mode = #tpu.pipeline_mode<synchronous>, transform_indices = @transform_16, window_bounds = array<i64: 4, 1>}, {transform_indices = @transform_17, window_bounds = array<i64: 2, 4, 256>}]} {
    %c0 = arith.constant 0 : index
    %c0_0 = arith.constant 0 : index
    %0 = vector.load %arg2[%c0, %c0_0] : memref<4x256xf32, #tpu.memory_space<vmem>>, vector<4x256xf32>
    %c0_1 = arith.constant 0 : index
    %c0_2 = arith.constant 0 : index
    %1 = vector.load %arg3[%c0_1, %c0_2] : memref<4x256xf32, #tpu.memory_space<vmem>>, vector<4x256xf32>
    %c0_3 = arith.constant 0 : index
    %c0_4 = arith.constant 0 : index
    %2 = vector.load %arg4[%c0_3, %c0_4] : memref<8x4xf32, #tpu.memory_space<vmem>>, vector<8x4xf32>
    %c0_5 = arith.constant 0 : index
    %c0_6 = arith.constant 0 : index
    %3 = vector.load %arg5[%c0_5, %c0_6] : memref<8x1xf32, #tpu.memory_space<vmem>>, vector<8x1xf32>
    %c0_7 = arith.constant 0 : index
    %c0_8 = arith.constant 0 : index
    %4 = vector.load %arg6[%c0_7, %c0_8] : memref<4x8xf32, #tpu.memory_space<vmem>>, vector<4x8xf32>
    %c0_9 = arith.constant 0 : index
    %c0_10 = arith.constant 0 : index
    %5 = vector.load %arg7[%c0_9, %c0_10] : memref<4x1xf32, #tpu.memory_space<vmem>>, vector<4x1xf32>
    %c0_11 = arith.constant 0 : index
    %c0_12 = arith.constant 0 : index
    %6 = vector.load %arg8[%c0_11, %c0_12] : memref<4x4xf32, #tpu.memory_space<vmem>>, vector<4x4xf32>
    %c0_13 = arith.constant 0 : index
    %c0_14 = arith.constant 0 : index
    %7 = vector.load %arg9[%c0_13, %c0_14] : memref<4x1xf32, #tpu.memory_space<vmem>>, vector<4x1xf32>
    %c0_15 = arith.constant 0 : index
    %c0_16 = arith.constant 0 : index
    %8 = vector.load %arg10[%c0_15, %c0_16] : memref<4x4xf32, #tpu.memory_space<vmem>>, vector<4x4xf32>
    %c0_17 = arith.constant 0 : index
    %c0_18 = arith.constant 0 : index
    %9 = vector.load %arg11[%c0_17, %c0_18] : memref<4x1xf32, #tpu.memory_space<vmem>>, vector<4x1xf32>
    %c0_19 = arith.constant 0 : index
    %c0_20 = arith.constant 0 : index
    %10 = vector.load %arg12[%c0_19, %c0_20] : memref<4x256xf32, #tpu.memory_space<vmem>>, vector<4x256xf32>
    %c0_21 = arith.constant 0 : index
    %c0_22 = arith.constant 0 : index
    %11 = vector.load %arg13[%c0_21, %c0_22] : memref<4x256xf32, #tpu.memory_space<vmem>>, vector<4x256xf32>
    %c0_23 = arith.constant 0 : index
    %c0_24 = arith.constant 0 : index
    %12 = vector.load %arg14[%c0_23, %c0_24] : memref<4x4xf32, #tpu.memory_space<vmem>>, vector<4x4xf32>
    %c0_25 = arith.constant 0 : index
    %c0_26 = arith.constant 0 : index
    %13 = vector.load %arg15[%c0_25, %c0_26] : memref<4x1xf32, #tpu.memory_space<vmem>>, vector<4x1xf32>
    %c0_27 = arith.constant 0 : index
    %c0_28 = arith.constant 0 : index
    %14 = vector.load %arg16[%c0_27, %c0_28] : memref<4x4xf32, #tpu.memory_space<vmem>>, vector<4x4xf32>
    %c0_29 = arith.constant 0 : index
    %c0_30 = arith.constant 0 : index
    %15 = vector.load %arg17[%c0_29, %c0_30] : memref<4x1xf32, #tpu.memory_space<vmem>>, vector<4x1xf32>
    %c0_31 = arith.constant 0 : index
    %c0_32 = arith.constant 0 : index
    %c0_33 = arith.constant 0 : index
    %16 = vector.load %arg1[%c0_31, %c0_32, %c0_33] : memref<2x4x256xf32, #tpu.memory_space<vmem>>, vector<1x4x256xf32>
    %17 = vector.shape_cast %16 : vector<1x4x256xf32> to vector<4x256xf32>
    %18 = vector.shape_cast %17 : vector<4x256xf32> to vector<1x4x256xf32>
    %cst = arith.constant dense<0.000000e+00> : vector<1xf32>
    %19 = vector.multi_reduction <add>, %18, %cst [1, 2] : vector<1x4x256xf32> to vector<1xf32>
    %20 = vector.shape_cast %19 : vector<1xf32> to vector<1x1x1xf32>
    %21 = vector.extract %20[0, 0, 0] : f32 from vector<1x1x1xf32>
    %cst_34 = arith.constant 9.765625E-4 : f32
    %22 = arith.mulf %21, %cst_34 : f32
    %23 = vector.broadcast %22 : f32 to vector<4x256xf32>
    %24 = arith.subf %17, %23 : vector<4x256xf32>
    %25 = arith.mulf %24, %24 : vector<4x256xf32>
    %26 = vector.shape_cast %25 : vector<4x256xf32> to vector<1x4x256xf32>
    %cst_35 = arith.constant dense<0.000000e+00> : vector<1xf32>
    %27 = vector.multi_reduction <add>, %26, %cst_35 [1, 2] : vector<1x4x256xf32> to vector<1xf32>
    %28 = vector.shape_cast %27 : vector<1xf32> to vector<1x1x1xf32>
    %29 = vector.extract %28[0, 0, 0] : f32 from vector<1x1x1xf32>
    %cst_36 = arith.constant 9.765625E-4 : f32
    %30 = arith.mulf %29, %cst_36 : f32
    %cst_37 = arith.constant 9.99999974E-6 : f32
    %31 = arith.addf %30, %cst_37 : f32
    %32 = math.rsqrt %31 : f32
    %33 = vector.broadcast %32 : f32 to vector<4x256xf32>
    %34 = arith.mulf %24, %33 : vector<4x256xf32>
    %35 = arith.mulf %34, %0 : vector<4x256xf32>
    %36 = arith.addf %35, %1 : vector<4x256xf32>
    %cst_38 = arith.constant dense<0.000000e+00> : vector<8x256xf32>
    %37 = tpu.matmul %2, %36, %cst_38 {dimension_numbers = #tpu.dot_dimension_numbers<[1], [0], [0], [1], [0, 0, 1, 1], [], []>} : vector<8x4xf32>, vector<4x256xf32>, vector<8x256xf32> -> vector<8x256xf32>
    %38 = vector.broadcast %3 : vector<8x1xf32> to vector<8x256xf32>
    %39 = arith.addf %37, %38 : vector<8x256xf32>
    %cst_39 = arith.constant dense<0.000000e+00> : vector<4x256xf32>
    %40 = tpu.matmul %4, %39, %cst_39 {dimension_numbers = #tpu.dot_dimension_numbers<[1], [0], [0], [1], [0, 0, 1, 1], [], []>} : vector<4x8xf32>, vector<8x256xf32>, vector<4x256xf32> -> vector<4x256xf32>
    %41 = vector.broadcast %5 : vector<4x1xf32> to vector<4x256xf32>
    %42 = arith.addf %40, %41 : vector<4x256xf32>
    %43 = arith.negf %42 : vector<4x256xf32>
    %44 = math.exp %43 : vector<4x256xf32>
    %cst_40 = arith.constant 1.000000e+00 : f32
    %45 = vector.broadcast %cst_40 : f32 to vector<4x256xf32>
    %46 = arith.addf %45, %44 : vector<4x256xf32>
    %47 = arith.divf %45, %46 : vector<4x256xf32>
    %cst_41 = arith.constant dense<0.000000e+00> : vector<4x256xf32>
    %48 = tpu.matmul %6, %47, %cst_41 {dimension_numbers = #tpu.dot_dimension_numbers<[1], [0], [0], [1], [0, 0, 1, 1], [], []>} : vector<4x4xf32>, vector<4x256xf32>, vector<4x256xf32> -> vector<4x256xf32>
    %cst_42 = arith.constant dense<0.000000e+00> : vector<4xf32>
    %49 = vector.multi_reduction <add>, %48, %cst_42 [1] : vector<4x256xf32> to vector<4xf32>
    %50 = vector.shape_cast %49 : vector<4xf32> to vector<4x1xf32>
    %cst_43 = arith.constant 3.906250e-03 : f32
    %51 = vector.broadcast %cst_43 : f32 to vector<4x1xf32>
    %52 = arith.mulf %50, %51 : vector<4x1xf32>
    %53 = arith.addf %52, %7 : vector<4x1xf32>
    %54 = vector.broadcast %53 : vector<4x1xf32> to vector<4x256xf32>
    %55 = arith.mulf %47, %54 : vector<4x256xf32>
    %cst_44 = arith.constant dense<0.000000e+00> : vector<4x256xf32>
    %56 = tpu.matmul %8, %55, %cst_44 {dimension_numbers = #tpu.dot_dimension_numbers<[1], [0], [0], [1], [0, 0, 1, 1], [], []>} : vector<4x4xf32>, vector<4x256xf32>, vector<4x256xf32> -> vector<4x256xf32>
    %57 = vector.broadcast %9 : vector<4x1xf32> to vector<4x256xf32>
    %58 = arith.addf %56, %57 : vector<4x256xf32>
    %59 = arith.addf %58, %17 : vector<4x256xf32>
    %60 = vector.shape_cast %59 : vector<4x256xf32> to vector<1x4x256xf32>
    %cst_45 = arith.constant dense<0.000000e+00> : vector<1xf32>
    %61 = vector.multi_reduction <add>, %60, %cst_45 [1, 2] : vector<1x4x256xf32> to vector<1xf32>
    %62 = vector.shape_cast %61 : vector<1xf32> to vector<1x1x1xf32>
    %63 = vector.extract %62[0, 0, 0] : f32 from vector<1x1x1xf32>
    %cst_46 = arith.constant 9.765625E-4 : f32
    %64 = arith.mulf %63, %cst_46 : f32
    %65 = vector.broadcast %64 : f32 to vector<4x256xf32>
    %66 = arith.subf %59, %65 : vector<4x256xf32>
    %67 = arith.mulf %66, %66 : vector<4x256xf32>
    %68 = vector.shape_cast %67 : vector<4x256xf32> to vector<1x4x256xf32>
    %cst_47 = arith.constant dense<0.000000e+00> : vector<1xf32>
    %69 = vector.multi_reduction <add>, %68, %cst_47 [1, 2] : vector<1x4x256xf32> to vector<1xf32>
    %70 = vector.shape_cast %69 : vector<1xf32> to vector<1x1x1xf32>
    %71 = vector.extract %70[0, 0, 0] : f32 from vector<1x1x1xf32>
    %cst_48 = arith.constant 9.765625E-4 : f32
    %72 = arith.mulf %71, %cst_48 : f32
    %cst_49 = arith.constant 9.99999974E-6 : f32
    %73 = arith.addf %72, %cst_49 : f32
    %74 = math.rsqrt %73 : f32
    %75 = vector.broadcast %74 : f32 to vector<4x256xf32>
    %76 = arith.mulf %66, %75 : vector<4x256xf32>
    %77 = arith.mulf %76, %10 : vector<4x256xf32>
    %78 = arith.addf %77, %11 : vector<4x256xf32>
    %cst_50 = arith.constant dense<0.000000e+00> : vector<4x256xf32>
    %79 = tpu.matmul %12, %78, %cst_50 {dimension_numbers = #tpu.dot_dimension_numbers<[1], [0], [0], [1], [0, 0, 1, 1], [], []>} : vector<4x4xf32>, vector<4x256xf32>, vector<4x256xf32> -> vector<4x256xf32>
    %80 = vector.broadcast %13 : vector<4x1xf32> to vector<4x256xf32>
    %81 = arith.addf %79, %80 : vector<4x256xf32>
    %82 = arith.negf %81 : vector<4x256xf32>
    %83 = math.exp %82 : vector<4x256xf32>
    %cst_51 = arith.constant 1.000000e+00 : f32
    %84 = vector.broadcast %cst_51 : f32 to vector<4x256xf32>
    %85 = arith.addf %84, %83 : vector<4x256xf32>
    %86 = arith.divf %84, %85 : vector<4x256xf32>
    %cst_52 = arith.constant dense<0.000000e+00> : vector<4x256xf32>
    %87 = tpu.matmul %14, %86, %cst_52 {dimension_numbers = #tpu.dot_dimension_numbers<[1], [0], [0], [1], [0, 0, 1, 1], [], []>} : vector<4x4xf32>, vector<4x256xf32>, vector<4x256xf32> -> vector<4x256xf32>
    %88 = vector.broadcast %15 : vector<4x1xf32> to vector<4x256xf32>
    %89 = arith.addf %87, %88 : vector<4x256xf32>
    %90 = arith.addf %89, %59 : vector<4x256xf32>
    %c0_53 = arith.constant 0 : index
    %c0_54 = arith.constant 0 : index
    %c0_55 = arith.constant 0 : index
    %91 = vector.load %arg18[%c0_53, %c0_54, %c0_55] : memref<2x4x256xf32, #tpu.memory_space<vmem>>, vector<1x4x256xf32>
    %92 = vector.shape_cast %91 : vector<1x4x256xf32> to vector<4x256xf32>
    %93 = vector.shape_cast %90 : vector<4x256xf32> to vector<1x4x256xf32>
    tpu.vector_store %arg18[%c0_53, %c0_54, %c0_55], %93 {strides = array<i32>} : memref<2x4x256xf32, #tpu.memory_space<vmem>>, vector<1x4x256xf32>,
    %c1 = arith.constant 1 : index
    %c0_56 = arith.constant 0 : index
    %c0_57 = arith.constant 0 : index
    %94 = vector.load %arg1[%c1, %c0_56, %c0_57] : memref<2x4x256xf32, #tpu.memory_space<vmem>>, vector<1x4x256xf32>
    %95 = vector.shape_cast %94 : vector<1x4x256xf32> to vector<4x256xf32>
    %96 = vector.shape_cast %95 : vector<4x256xf32> to vector<1x4x256xf32>
    %cst_58 = arith.constant dense<0.000000e+00> : vector<1xf32>
    %97 = vector.multi_reduction <add>, %96, %cst_58 [1, 2] : vector<1x4x256xf32> to vector<1xf32>
    %98 = vector.shape_cast %97 : vector<1xf32> to vector<1x1x1xf32>
    %99 = vector.extract %98[0, 0, 0] : f32 from vector<1x1x1xf32>
    %cst_59 = arith.constant 9.765625E-4 : f32
    %100 = arith.mulf %99, %cst_59 : f32
    %101 = vector.broadcast %100 : f32 to vector<4x256xf32>
    %102 = arith.subf %95, %101 : vector<4x256xf32>
    %103 = arith.mulf %102, %102 : vector<4x256xf32>
    %104 = vector.shape_cast %103 : vector<4x256xf32> to vector<1x4x256xf32>
    %cst_60 = arith.constant dense<0.000000e+00> : vector<1xf32>
    %105 = vector.multi_reduction <add>, %104, %cst_60 [1, 2] : vector<1x4x256xf32> to vector<1xf32>
    %106 = vector.shape_cast %105 : vector<1xf32> to vector<1x1x1xf32>
    %107 = vector.extract %106[0, 0, 0] : f32 from vector<1x1x1xf32>
    %cst_61 = arith.constant 9.765625E-4 : f32
    %108 = arith.mulf %107, %cst_61 : f32
    %cst_62 = arith.constant 9.99999974E-6 : f32
    %109 = arith.addf %108, %cst_62 : f32
    %110 = math.rsqrt %109 : f32
    %111 = vector.broadcast %110 : f32 to vector<4x256xf32>
    %112 = arith.mulf %102, %111 : vector<4x256xf32>
    %113 = arith.mulf %112, %0 : vector<4x256xf32>
    %114 = arith.addf %113, %1 : vector<4x256xf32>
    %cst_63 = arith.constant dense<0.000000e+00> : vector<8x256xf32>
    %115 = tpu.matmul %2, %114, %cst_63 {dimension_numbers = #tpu.dot_dimension_numbers<[1], [0], [0], [1], [0, 0, 1, 1], [], []>} : vector<8x4xf32>, vector<4x256xf32>, vector<8x256xf32> -> vector<8x256xf32>
    %116 = vector.broadcast %3 : vector<8x1xf32> to vector<8x256xf32>
    %117 = arith.addf %115, %116 : vector<8x256xf32>
    %cst_64 = arith.constant dense<0.000000e+00> : vector<4x256xf32>
    %118 = tpu.matmul %4, %117, %cst_64 {dimension_numbers = #tpu.dot_dimension_numbers<[1], [0], [0], [1], [0, 0, 1, 1], [], []>} : vector<4x8xf32>, vector<8x256xf32>, vector<4x256xf32> -> vector<4x256xf32>
    %119 = vector.broadcast %5 : vector<4x1xf32> to vector<4x256xf32>
    %120 = arith.addf %118, %119 : vector<4x256xf32>
    %121 = arith.negf %120 : vector<4x256xf32>
    %122 = math.exp %121 : vector<4x256xf32>
    %cst_65 = arith.constant 1.000000e+00 : f32
    %123 = vector.broadcast %cst_65 : f32 to vector<4x256xf32>
    %124 = arith.addf %123, %122 : vector<4x256xf32>
    %125 = arith.divf %123, %124 : vector<4x256xf32>
    %cst_66 = arith.constant dense<0.000000e+00> : vector<4x256xf32>
    %126 = tpu.matmul %6, %125, %cst_66 {dimension_numbers = #tpu.dot_dimension_numbers<[1], [0], [0], [1], [0, 0, 1, 1], [], []>} : vector<4x4xf32>, vector<4x256xf32>, vector<4x256xf32> -> vector<4x256xf32>
    %cst_67 = arith.constant dense<0.000000e+00> : vector<4xf32>
    %127 = vector.multi_reduction <add>, %126, %cst_67 [1] : vector<4x256xf32> to vector<4xf32>
    %128 = vector.shape_cast %127 : vector<4xf32> to vector<4x1xf32>
    %cst_68 = arith.constant 3.906250e-03 : f32
    %129 = vector.broadcast %cst_68 : f32 to vector<4x1xf32>
    %130 = arith.mulf %128, %129 : vector<4x1xf32>
    %131 = arith.addf %130, %7 : vector<4x1xf32>
    %132 = vector.broadcast %131 : vector<4x1xf32> to vector<4x256xf32>
    %133 = arith.mulf %125, %132 : vector<4x256xf32>
    %cst_69 = arith.constant dense<0.000000e+00> : vector<4x256xf32>
    %134 = tpu.matmul %8, %133, %cst_69 {dimension_numbers = #tpu.dot_dimension_numbers<[1], [0], [0], [1], [0, 0, 1, 1], [], []>} : vector<4x4xf32>, vector<4x256xf32>, vector<4x256xf32> -> vector<4x256xf32>
    %135 = vector.broadcast %9 : vector<4x1xf32> to vector<4x256xf32>
    %136 = arith.addf %134, %135 : vector<4x256xf32>
    %137 = arith.addf %136, %95 : vector<4x256xf32>
    %138 = vector.shape_cast %137 : vector<4x256xf32> to vector<1x4x256xf32>
    %cst_70 = arith.constant dense<0.000000e+00> : vector<1xf32>
    %139 = vector.multi_reduction <add>, %138, %cst_70 [1, 2] : vector<1x4x256xf32> to vector<1xf32>
    %140 = vector.shape_cast %139 : vector<1xf32> to vector<1x1x1xf32>
    %141 = vector.extract %140[0, 0, 0] : f32 from vector<1x1x1xf32>
    %cst_71 = arith.constant 9.765625E-4 : f32
    %142 = arith.mulf %141, %cst_71 : f32
    %143 = vector.broadcast %142 : f32 to vector<4x256xf32>
    %144 = arith.subf %137, %143 : vector<4x256xf32>
    %145 = arith.mulf %144, %144 : vector<4x256xf32>
    %146 = vector.shape_cast %145 : vector<4x256xf32> to vector<1x4x256xf32>
    %cst_72 = arith.constant dense<0.000000e+00> : vector<1xf32>
    %147 = vector.multi_reduction <add>, %146, %cst_72 [1, 2] : vector<1x4x256xf32> to vector<1xf32>
    %148 = vector.shape_cast %147 : vector<1xf32> to vector<1x1x1xf32>
    %149 = vector.extract %148[0, 0, 0] : f32 from vector<1x1x1xf32>
    %cst_73 = arith.constant 9.765625E-4 : f32
    %150 = arith.mulf %149, %cst_73 : f32
    %cst_74 = arith.constant 9.99999974E-6 : f32
    %151 = arith.addf %150, %cst_74 : f32
    %152 = math.rsqrt %151 : f32
    %153 = vector.broadcast %152 : f32 to vector<4x256xf32>
    %154 = arith.mulf %144, %153 : vector<4x256xf32>
    %155 = arith.mulf %154, %10 : vector<4x256xf32>
    %156 = arith.addf %155, %11 : vector<4x256xf32>
    %cst_75 = arith.constant dense<0.000000e+00> : vector<4x256xf32>
    %157 = tpu.matmul %12, %156, %cst_75 {dimension_numbers = #tpu.dot_dimension_numbers<[1], [0], [0], [1], [0, 0, 1, 1], [], []>} : vector<4x4xf32>, vector<4x256xf32>, vector<4x256xf32> -> vector<4x256xf32>
    %158 = vector.broadcast %13 : vector<4x1xf32> to vector<4x256xf32>
    %159 = arith.addf %157, %158 : vector<4x256xf32>
    %160 = arith.negf %159 : vector<4x256xf32>
    %161 = math.exp %160 : vector<4x256xf32>
    %cst_76 = arith.constant 1.000000e+00 : f32
    %162 = vector.broadcast %cst_76 : f32 to vector<4x256xf32>
    %163 = arith.addf %162, %161 : vector<4x256xf32>
    %164 = arith.divf %162, %163 : vector<4x256xf32>
    %cst_77 = arith.constant dense<0.000000e+00> : vector<4x256xf32>
    %165 = tpu.matmul %14, %164, %cst_77 {dimension_numbers = #tpu.dot_dimension_numbers<[1], [0], [0], [1], [0, 0, 1, 1], [], []>} : vector<4x4xf32>, vector<4x256xf32>, vector<4x256xf32> -> vector<4x256xf32>
    %166 = vector.broadcast %15 : vector<4x1xf32> to vector<4x256xf32>
    %167 = arith.addf %165, %166 : vector<4x256xf32>
    %168 = arith.addf %167, %137 : vector<4x256xf32>
    %c1_78 = arith.constant 1 : index
    %c0_79 = arith.constant 0 : index
    %c0_80 = arith.constant 0 : index
    %169 = vector.load %arg18[%c1_78, %c0_79, %c0_80] : memref<2x4x256xf32, #tpu.memory_space<vmem>>, vector<1x4x256xf32>
    %170 = vector.shape_cast %169 : vector<1x4x256xf32> to vector<4x256xf32>
    %171 = vector.shape_cast %168 : vector<4x256xf32> to vector<1x4x256xf32>
    tpu.vector_store %arg18[%c1_78, %c0_79, %c0_80], %171 {strides = array<i32>} : memref<2x4x256xf32, #tpu.memory_space<vmem>>, vector<1x4x256xf32>,
    return
  }
  func.func @transform_0(%arg0: i32) -> (i32, i32, i32) {
    %c0_i32 = arith.constant 0 : i32
    %c0_i32_0 = arith.constant 0 : i32
    %c0_i32_1 = arith.constant 0 : i32
    return %arg0, %c0_i32, %c0_i32_0 : i32, i32, i32
  }
  func.func @transform_1(%arg0: i32) -> (i32, i32) {
    %c0_i32 = arith.constant 0 : i32
    %c0_i32_0 = arith.constant 0 : i32
    %c0_i32_1 = arith.constant 0 : i32
    return %c0_i32, %c0_i32_0 : i32, i32
  }
  func.func @transform_2(%arg0: i32) -> (i32, i32) {
    %c0_i32 = arith.constant 0 : i32
    %c0_i32_0 = arith.constant 0 : i32
    %c0_i32_1 = arith.constant 0 : i32
    return %c0_i32, %c0_i32_0 : i32, i32
  }
  func.func @transform_3(%arg0: i32) -> (i32, i32) {
    %c0_i32 = arith.constant 0 : i32
    %c0_i32_0 = arith.constant 0 : i32
    %c0_i32_1 = arith.constant 0 : i32
    return %c0_i32, %c0_i32_0 : i32, i32
  }
  func.func @transform_4(%arg0: i32) -> (i32, i32) {
    %c0_i32 = arith.constant 0 : i32
    %c0_i32_0 = arith.constant 0 : i32
    %c0_i32_1 = arith.constant 0 : i32
    return %c0_i32, %c0_i32_0 : i32, i32
  }
  func.func @transform_5(%arg0: i32) -> (i32, i32) {
    %c0_i32 = arith.constant 0 : i32
    %c0_i32_0 = arith.constant 0 : i32
    %c0_i32_1 = arith.constant 0 : i32
    return %c0_i32, %c0_i32_0 : i32, i32
  }
  func.func @transform_6(%arg0: i32) -> (i32, i32) {
    %c0_i32 = arith.constant 0 : i32
    %c0_i32_0 = arith.constant 0 : i32
    %c0_i32_1 = arith.constant 0 : i32
    return %c0_i32, %c0_i32_0 : i32, i32
  }
  func.func @transform_7(%arg0: i32) -> (i32, i32) {
    %c0_i32 = arith.constant 0 : i32
    %c0_i32_0 = arith.constant 0 : i32
    %c0_i32_1 = arith.constant 0 : i32
    return %c0_i32, %c0_i32_0 : i32, i32
  }
  func.func @transform_8(%arg0: i32) -> (i32, i32) {
    %c0_i32 = arith.constant 0 : i32
    %c0_i32_0 = arith.constant 0 : i32
    %c0_i32_1 = arith.constant 0 : i32
    return %c0_i32, %c0_i32_0 : i32, i32
  }
  func.func @transform_9(%arg0: i32) -> (i32, i32) {
    %c0_i32 = arith.constant 0 : i32
    %c0_i32_0 = arith.constant 0 : i32
    %c0_i32_1 = arith.constant 0 : i32
    return %c0_i32, %c0_i32_0 : i32, i32
  }
  func.func @transform_10(%arg0: i32) -> (i32, i32) {
    %c0_i32 = arith.constant 0 : i32
    %c0_i32_0 = arith.constant 0 : i32
    %c0_i32_1 = arith.constant 0 : i32
    return %c0_i32, %c0_i32_0 : i32, i32
  }
  func.func @transform_11(%arg0: i32) -> (i32, i32) {
    %c0_i32 = arith.constant 0 : i32
    %c0_i32_0 = arith.constant 0 : i32
    %c0_i32_1 = arith.constant 0 : i32
    return %c0_i32, %c0_i32_0 : i32, i32
  }
  func.func @transform_12(%arg0: i32) -> (i32, i32) {
    %c0_i32 = arith.constant 0 : i32
    %c0_i32_0 = arith.constant 0 : i32
    %c0_i32_1 = arith.constant 0 : i32
    return %c0_i32, %c0_i32_0 : i32, i32
  }
  func.func @transform_13(%arg0: i32) -> (i32, i32) {
    %c0_i32 = arith.constant 0 : i32
    %c0_i32_0 = arith.constant 0 : i32
    %c0_i32_1 = arith.constant 0 : i32
    return %c0_i32, %c0_i32_0 : i32, i32
  }
  func.func @transform_14(%arg0: i32) -> (i32, i32) {
    %c0_i32 = arith.constant 0 : i32
    %c0_i32_0 = arith.constant 0 : i32
    %c0_i32_1 = arith.constant 0 : i32
    return %c0_i32, %c0_i32_0 : i32, i32
  }
  func.func @transform_15(%arg0: i32) -> (i32, i32) {
    %c0_i32 = arith.constant 0 : i32
    %c0_i32_0 = arith.constant 0 : i32
    %c0_i32_1 = arith.constant 0 : i32
    return %c0_i32, %c0_i32_0 : i32, i32
  }
  func.func @transform_16(%arg0: i32) -> (i32, i32) {
    %c0_i32 = arith.constant 0 : i32
    %c0_i32_0 = arith.constant 0 : i32
    %c0_i32_1 = arith.constant 0 : i32
    return %c0_i32, %c0_i32_0 : i32, i32
  }
  func.func @transform_17(%arg0: i32) -> (i32, i32, i32) {
    %c0_i32 = arith.constant 0 : i32
    %c0_i32_0 = arith.constant 0 : i32
    %c0_i32_1 = arith.constant 0 : i32
    return %arg0, %c0_i32, %c0_i32_0 : i32, i32, i32
  }
}

</mosaic_0001>

<bundles_post_ra>
// kernel: tpu_custom_call.1
= control target key start
LH: loop header
LB: loop body
LE: loop exit
PB: predicated region body
PF: predicated region fallthrough
CT: control target
= control target key end

     0   :  { %s1814_s0 = inlined_call_operand.vmem [shape: f32[2,4,256], index: 0, kind: input, shape index: {}]   ;;  %s1815_s1 = inlined_call_operand.vmem [shape: f32[4,256], index: 1, kind: input, shape index: {}]   ;;  %s1816_s2 = inlined_call_operand.vmem [shape: f32[4,256], index: 2, kind: input, shape index: {}]   ;;  %s1817_s3 = inlined_call_operand.vmem [shape: f32[8,4], index: 3, kind: input, shape index: {}]   ;;  %s1818_s4 = inlined_call_operand.vmem [shape: f32[8,1], index: 4, kind: input, shape index: {}]   ;;  %s1819_s5 = inlined_call_operand.vmem [shape: f32[4,8], index: 5, kind: input, shape index: {}]   ;;  %s1820_s6 = inlined_call_operand.vmem [shape: f32[4,1], index: 6, kind: input, shape index: {}]   ;;  %s1821_s7 = inlined_call_operand.vmem [shape: f32[4,4], index: 7, kind: input, shape index: {}]   ;;  %s1822_s8 = inlined_call_operand.vmem [shape: f32[4,1], index: 8, kind: input, shape index: {}]   ;;  %s1823_s9 = inlined_call_operand.vmem [shape: f32[4,4], index: 9, kind: input, shape index: {}]   ;;  %s1824_s10 = inlined_call_operand.vmem [shape: f32[4,1], index: 10, kind: input, shape index: {}]   ;;  %s1825_s11 = inlined_call_operand.vmem [shape: f32[4,256], index: 11, kind: input, shape index: {}]   ;;  %s1826_s12 = inlined_call_operand.vmem [shape: f32[4,256], index: 12, kind: input, shape index: {}]   ;;  %s1827_s13 = inlined_call_operand.vmem [shape: f32[4,4], index: 13, kind: input, shape index: {}]   ;;  %s1828_s14 = inlined_call_operand.vmem [shape: f32[4,1], index: 14, kind: input, shape index: {}]   ;;  %s1829_s15 = inlined_call_operand.vmem [shape: f32[4,4], index: 15, kind: input, shape index: {}]   ;;  %s1830_s16 = inlined_call_operand.vmem [shape: f32[4,1], index: 16, kind: input, shape index: {}]   ;;  %s1831_s17 = inlined_call_operand.hbm [shape: f32[2,4,256], index: 17, kind: output, shape index: {}]  }
   0x1   :  { %1833 = sst [smem:[#allocation5_spill]] %s1814_s0 }
   0x2   :  { %1834 = sst [smem:[#allocation6_spill]] %s1815_s1 }
   0x3   :  { %s1835_s26 = sld [smem:[#allocation5_spill]]  ;;  %vm77_vm0 = vcmask 1043456  }
   0x9   :  { %v1559_v0 = vld [vmem:[%s1835_s26] sm:$0xff] }
   0xa   :  { %22 = vsyncpa [#allocation3], 0  ;;  %v1563_v1 = vcombine.high %v1559_v0, %v1559_v0  ;;  %v78_v2 = vsel %vm77_vm0, %v1559_v0, 0.0  ;;  %v1461_v26 = vmov 0.0   ;;  %v60_v27 = vld [vmem:[%s1818_s4] sm:$0xff]  ;;  %v1462_v28 = vmov 0  }
   0xb   :  { %197 = vmatprep.mubr.f32.mxu0 %v1461_v26  ;;  %277 = vmatprep.mubr.f32.mxu1 %v1461_v26  ;;  %v62_v29 = vld [vmem:[%s1820_s6] sm:$0xf]  ;;  %s1836_s23 = sld [smem:[#allocation6_spill]]  ;;  %vm125_vm1 = vcmask 31744   ;;  %vm209_vm2 = vcmask 64512  }
   0xc   :  { %v79_v3 = vsel %vm77_vm0, %v1563_v1, 0.0  ;;  %1391 = vset.pattern.permute.xlu1 %v1462_v28  ;;  %1392 = vset.pattern.permute.xlu0 %v1462_v28  ;;  %v1588_v35 = vld [vmem:[%s1816_s2] sm:$0xff] }
   0xd   :  { %v80_v4 = vadd.f32 %v79_v3, %v78_v2  ;;  %120 = vperm.xlu1 %1391, %v60_v27   ;;  %v1595_v39 = vld [vmem:[%s1817_s3] sm:$0xff] }
   0xe   :  { %v1609_v45 = vld [vmem:[%s1819_s5] sm:$0xf] }
   0xf   :  { %81 = vadd.xlane.f32.xlu0 %v80_v4  ;;  %v1621_v58 = vld [vmem:[%s1821_s7] sm:$0xf] }
  0x10   :  { %v1633_v3 = vld [vmem:[%s1822_s8] sm:$0xf] }
  0x11   :  { %206 = vperm.xlu1 %1391, %v62_v29   ;;  %v1583_v32 = vld [vmem:[%s1836_s23] sm:$0xff] }
  0x8c   :  { %v1602_v41 = vpop.permute.xlu1 %120 }
  0x90   :  { %v1614_v46 = vpop.permute.xlu1 %206 }
  0x9c   :  { %v82_v5 = vpop.xlane.xlu0 %81 }
  0x9d   :  { %v83_v6 = vrot.slane %v82_v5, 4 }
  0x9f   :  { %v84_v7 = vadd.f32 %v83_v6, %v82_v5 }
  0xa1   :  { %v85_v8 = vrot.slane %v84_v7, 2 }
  0xa3   :  { %v86_v9 = vadd.f32 %v85_v8, %v84_v7  ;;  %v66_v7 = vld [vmem:[%s1824_s10] sm:$0xf]  ;;  %s1463_s10 = smov [#allocation2]  }
  0xa5   :  { %v87_v10 = vrot.slane %v86_v9, 1 }
  0xa7   :  { %v88_v11 = vadd.f32 %v87_v10, %v86_v9 }
  0xa9   :  { %1362 = vpush %v88_v11  ;;  %v1642_v11 = vld [vmem:[%s1823_s9] sm:$0xf] }
  0xda   :  { %s1363_s27 = spop %1362 }
  0xdb   :  { %s90_s28 = smul.f32 0.0009765625, %s1363_s27 }
  0xdd   :  { %v91_v12 = vstv %s90_s28 }
  0xde   :  { %v92_v13 = vsub.f32 %v1559_v0, %v91_v12 }
  0xe0   :  { %v93_v14 = vmul.f32 %v92_v13, %v92_v13 }
  0xe2   :  { %v95_v15 = vcombine.high %v93_v14, %v93_v14  ;;  %v97_v16 = vsel %vm77_vm0, %v93_v14, 0.0 }
  0xe4   :  { %v98_v17 = vsel %vm77_vm0, %v95_v15, 0.0 }
  0xe5   :  { %v99_v18 = vadd.f32 %v98_v17, %v97_v16 }
  0xe7   :  { %100 = vadd.xlane.f32.xlu0 %v99_v18 }
 0x174   :  { %v101_v19 = vpop.xlane.xlu0 %100 }
 0x175   :  { %v102_v20 = vrot.slane %v101_v19, 4 }
 0x177   :  { %v103_v21 = vadd.f32 %v102_v20, %v101_v19 }
 0x179   :  { %v104_v22 = vrot.slane %v103_v21, 2 }
 0x17b   :  { %v105_v23 = vadd.f32 %v104_v22, %v103_v21 }
 0x17d   :  { %v106_v24 = vrot.slane %v105_v23, 1 }
 0x17f   :  { %v107_v25 = vadd.f32 %v106_v24, %v105_v23 }
 0x181   :  { %1364 = vpush %v107_v25 }
 0x1b2   :  { %s1365_s19 = spop %1364 }
 0x1b3   :  { %s109_s1 = smul.f32 0.0009765625, %s1365_s19 }
 0x1b5   :  { %s110_s20 = sadd.f32 1e-05, %s109_s1  ;;  %s1310_s1 = sshll.u32 %s1463_s10, 4  ;;  %s1311_s1 = int_to_ptr.vmem [resolvable:$true] %s1310_s1 }
 0x1b6   :  { %p1442_p1 = scmp.lt.s32.totalorder %s1311_s1, %s1311_s1 }
 0x1b7   :  { %v111_v30 = vstv %s110_s20 }
 0x1b8   :  { %1397 = vrsqrt.f32 %v111_v30 }
 0x1c2   :  { %v1398_v31 = vpop.eup %1397 }
 0x1c3   :  { %1366 = vpush %v1398_v31 }
 0x1f4   :  { %s1367_s21 = spop %1366 }
 0x1f5   :  { %v114_v33 = vstv %s1367_s21 }
 0x1f6   :  { %v115_v34 = vmul.f32 %v114_v33, %v92_v13 }
 0x1f8   :  { %v116_v36 = vmul.f32 %v115_v34, %v1583_v32 }
 0x1fa   :  { %v117_v37 = vadd.f32 %v116_v36, %v1588_v35 }
 0x1fc   :  { %v124_v38 = vcombine.high %v117_v37, %v117_v37 }
 0x1fe   :  { %1321 = vmatprep.subr.msk.mxu0 %vm77_vm0, %v124_v38 }
 0x1ff   :  { %1322 = vmatpush1.msk.msra.mxu0 %vm77_vm0, %v117_v37 }
 0x200   :  { %1323 = vmatmul.mubr.msk.f32.vlgmr.msra.gmra.mrb[0].mxu0 %vm125_vm1, %v1595_v39 }
 0x201   :  { %369 = vmatprep.mubr.f32.mxu0 %v1461_v26 }
 0x2d3   :  { %v199_v40 = vpop.f32.mrb[0].mxu0 }
 0x2d4   :  { %v201_v42 = vpop.f32.mrb[1].mxu0  ;;  %v200_v44 = vadd.f32 %v199_v40, %v1602_v41 }
 0x2d5   :  { %v202_v43 = vadd.f32 %v201_v42, %v1602_v41 }
 0x2d7   :  { %213 = vmatprep.subr.mxu1 %v202_v43 }
 0x2d8   :  { %214 = vmatpush1.msra.mxu1 %v200_v44 }
 0x2d9   :  { %1324 = vmatmul.mubr.msk.f32.vlgmr.msra.gmra.mrb[0].mxu1 %vm209_vm2, %v1609_v45 }
 0x2da   :  { %468 = vmatprep.mubr.f32.mxu1 %v1461_v26 }
 0x3ac   :  { %v279_v47 = vpop.f32.mrb[0].mxu1 }
 0x3ad   :  { %v280_v48 = vadd.f32 %v279_v47, %v1614_v46  ;;  %v281_v49 = vpop.f32.mrb[1].mxu1  ;;  %v70_v47 = vld [vmem:[%s1828_s14] sm:$0xf] }
 0x3ae   :  { %v282_v50 = vadd.f32 %v281_v49, %v1614_v46 }
 0x3af   :  { %v1325_v51 = vmul.f32 -1.442695, %v280_v48 }
 0x3b0   :  { %v1326_v52 = vmul.f32 -1.442695, %v282_v50 }
 0x3b1   :  { %1399 = vpow2.f32 %v1325_v51 }
 0x3b2   :  { %1401 = vpow2.f32 %v1326_v52 }
 0x3bb   :  { %v1400_v53 = vpop.eup %1399 }
 0x3bc   :  { %v1402_v54 = vpop.eup %1401  ;;  %v290_v55 = vadd.f32 1.0, %v1400_v53 }
 0x3bd   :  { %v291_v56 = vadd.f32 1.0, %v1402_v54 }
 0x3bf   :  { %1403 = vrcp.f32 %v291_v56 }
 0x3c0   :  { %1405 = vrcp.f32 %v290_v55 }
 0x3c9   :  { %v1404_v57 = vpop.eup %1403 }
 0x3ca   :  { %v1406_v59 = vpop.eup %1405  ;;  %1327 = vmatprep.subr.msk.mxu0 %vm77_vm0, %v1404_v57 }
 0x3cb   :  { %1328 = vmatpush1.msk.msra.mxu0 %vm77_vm0, %v1406_v59 }
 0x3cc   :  { %1329 = vmatmul.mubr.msk.f32.vlgmr.msra.gmra.mrb[2].mxu0 %vm125_vm1, %v1621_v58 }
 0x3cd   :  { %603 = vmatprep.mubr.f32.mxu0 %v1461_v26 }
 0x49f   :  { %v371_v60 = vpop.f32.mrb[2].mxu0 }
 0x4a0   :  { %v376_v61 = vsel %vm77_vm0, %v371_v60, 0.0  ;;  %v373_v62 = vpop.f32.mrb[3].mxu0 }
 0x4a1   :  { %v377_v63 = vsel %vm77_vm0, %v373_v62, 0.0 }
 0x4a2   :  { %v378_v2 = vadd.f32 %v377_v63, %v376_v61 }
 0x4a4   :  { %379 = vadd.xlane.f32.xlu0 %v378_v2 }
 0x4ba   :  { %392 = vperm.xlu0 %1392, %v66_v7  }
 0x531   :  { %v380_v4 = vpop.xlane.xlu0 %379 }
 0x532   :  { %v381_v5 = vmul.f32 0.00390625, %v380_v4  ;;  %v1686_v4 = vld [vmem:[%s1825_s11] sm:$0xff] }
 0x534   :  { %v382_v6 = vadd.f32 %v381_v5, %v1633_v3  ;;  %v1691_v5 = vld [vmem:[%s1826_s12] sm:$0xff] }
 0x536   :  { %385 = vperm.xlu1 %1391, %v382_v6   ;;  %v1695_v6 = vcombine.high %v1686_v4, %v1686_v4 }
 0x539   :  { %v1649_v12 = vpop.permute.xlu0 %392 }
 0x5b5   :  { %v386_v8 = vpop.permute.xlu1 %385 }
 0x5b6   :  { %v388_v9 = vmul.f32 %v1406_v59, %v386_v8  ;;  %v389_v10 = vmul.f32 %v1404_v57, %v386_v8 }
 0x5b8   :  { %1330 = vmatprep.subr.msk.mxu1 %vm77_vm0, %v389_v10  ;;  %v1699_v10 = vcombine.high %v1691_v5, %v1691_v5 }
 0x5b9   :  { %1331 = vmatpush1.msk.msra.mxu1 %vm77_vm0, %v388_v9 }
 0x5ba   :  { %1332 = vmatmul.mubr.msk.f32.vlgmr.msra.gmra.mrb[2].mxu1 %vm125_vm1, %v1642_v11 }
 0x5bb   :  { %700 = vmatprep.mubr.f32.mxu1 %v1461_v26 }
 0x68d   :  { %v470_v13 = vpop.f32.mrb[2].mxu1 }
 0x68e   :  { %v471_v14 = vadd.f32 %v470_v13, %v1649_v12  ;;  %v472_v15 = vpop.f32.mrb[3].mxu1 }
 0x68f   :  { %v473_v16 = vadd.f32 %v472_v15, %v1649_v12 }
 0x690   :  { %v1654_v17 = vadd.f32 %v471_v14, %v1559_v0  ;;  %v1666_v0 = vld [vmem:[%s1835_s26 + $0x8] sm:$0xff]  ;;  %s1437_s26 = scalar_lea.vmem %s1311_s1, 256 }
 0x691   :  { %v1657_v18 = vadd.f32 %v473_v16, %v1563_v1  ;;  %v1672_v33 = vcombine.high %v1666_v0, %v1666_v0  ;;  %v719_v40 = vsel %vm77_vm0, %v1666_v0, 0.0  ;;  %p1438_p0 = scmp.ne.s32.totalorder %s1311_s1, %s1437_s26  ;;  %p1443_p2 = scmp.lt.s32.totalorder %s1437_s26, %s1437_s26 }
 0x692   :  { %v477_v19 = vsel %vm77_vm0, %v1654_v17, 0.0 }
 0x693   :  { %v478_v20 = vsel %vm77_vm0, %v1657_v18, 0.0  ;;  %v720_v42 = vsel %vm77_vm0, %v1672_v33, 0.0  ;;  %p1444_p3 = por %p1443_p2, %p1442_p1 }
 0x694   :  { %v479_v21 = vadd.f32 %v478_v20, %v477_v19  ;;  %v721_v44 = vadd.f32 %v720_v42, %v719_v40 }
 0x695   :  { %p1445_p4 = pnand %p1444_p3, %p1438_p0 }
 0x696   :  { %480 = vadd.xlane.f32.xlu1 %v479_v21 }
 0x723   :  { %v481_v22 = vpop.xlane.xlu1 %480 }
 0x724   :  { %v482_v23 = vrot.slane %v481_v22, 4 }
 0x726   :  { %v483_v24 = vadd.f32 %v482_v23, %v481_v22  ;;  %v1709_v22 = vld [vmem:[%s1827_s13] sm:$0xf] }
 0x728   :  { %v484_v25 = vrot.slane %v483_v24, 2 }
 0x72a   :  { %v485_v27 = vadd.f32 %v484_v25, %v483_v24 }
 0x72c   :  { %v486_v28 = vrot.slane %v485_v27, 1 }
 0x72e   :  { %v487_v29 = vadd.f32 %v486_v28, %v485_v27 }
 0x730   :  { %1368 = vpush %v487_v29 }
 0x761   :  { %s1369_s8 = spop %1368 }
 0x762   :  { %s489_s9 = smul.f32 0.0009765625, %s1369_s8 }
 0x764   :  { %v490_v1 = vstv %s489_s9 }
 0x765   :  { %v491_v30 = vsub.f32 %v1654_v17, %v490_v1  ;;  %v492_v31 = vsub.f32 %v1657_v18, %v490_v1 }
 0x767   :  { %v493_v34 = vmul.f32 %v491_v30, %v491_v30  ;;  %v494_v36 = vmul.f32 %v492_v31, %v492_v31 }
 0x769   :  { %v495_v37 = vsel %vm77_vm0, %v493_v34, 0.0  ;;  %v496_v38 = vsel %vm77_vm0, %v494_v36, 0.0 }
 0x76a   :  { %v497_v43 = vadd.f32 %v496_v38, %v495_v37 }
 0x76c   :  { %498 = vadd.xlane.f32.xlu1 %v497_v43 }
 0x770   :  { %722 = vadd.xlane.f32.xlu1 %v721_v44 }
 0x781   :  { %527 = vperm.xlu1 %1391, %v70_v47  }
 0x7f9   :  { %v499_v48 = vpop.xlane.xlu1 %498 }
 0x7fa   :  { %v500_v49 = vrot.slane %v499_v48, 4 }
 0x7fc   :  { %v501_v50 = vadd.f32 %v500_v49, %v499_v48 }
 0x7fd   :  { %v723_v55 = vpop.xlane.xlu1 %722 }
 0x7fe   :  { %v502_v51 = vrot.slane %v501_v50, 2  ;;  %v724_v56 = vrot.slane %v723_v55, 4 }
 0x800   :  { %v503_v52 = vadd.f32 %v502_v51, %v501_v50  ;;  %v725_v57 = vadd.f32 %v724_v56, %v723_v55 }
 0x801   :  { %v1718_v37 = vpop.permute.xlu1 %527 }
 0x802   :  { %v504_v53 = vrot.slane %v503_v52, 1  ;;  %v726_v59 = vrot.slane %v725_v57, 2 }
 0x804   :  { %v505_v54 = vadd.f32 %v504_v53, %v503_v52  ;;  %v727_v61 = vadd.f32 %v726_v59, %v725_v57 }
 0x806   :  { %1370 = vpush %v505_v54  ;;  %v728_v62 = vrot.slane %v727_v61, 1 }
 0x808   :  { %v729_v2 = vadd.f32 %v728_v62, %v727_v61  ;;  %v1734_v62 = vld [vmem:[%s1829_s15] sm:$0xf] }
 0x837   :  { %s1371_s21 = spop %1370 }
 0x838   :  { %s507_s22 = smul.f32 0.0009765625, %s1371_s21 }
 0x83a   :  { %s508_s4 = sadd.f32 1e-05, %s507_s22 }
 0x83c   :  { %v509_v60 = vstv %s508_s4 }
 0x83d   :  { %1407 = vrsqrt.f32 %v509_v60 }
 0x847   :  { %v1408_v63 = vpop.eup %1407 }
 0x848   :  { %1372 = vpush %v1408_v63 }
 0x849   :  { %1374 = vpush %v729_v2 }
 0x879   :  { %s1373_s6 = spop %1372 }
 0x87a   :  { %v512_v7 = vstv %s1373_s6  ;;  %s1375_s27 = spop %1374 }
 0x87b   :  { %v513_v8 = vmul.f32 %v512_v7, %v491_v30  ;;  %v514_v9 = vmul.f32 %v512_v7, %v492_v31  ;;  %s731_s11 = smul.f32 0.0009765625, %s1375_s27 }
 0x87d   :  { %v518_v13 = vmul.f32 %v513_v8, %v1686_v4  ;;  %v519_v14 = vmul.f32 %v1695_v6, %v514_v9  ;;  %v732_v15 = vstv %s731_s11 }
 0x87e   :  { %v733_v16 = vsub.f32 %v1666_v0, %v732_v15 }
 0x87f   :  { %v523_v19 = vadd.f32 %v518_v13, %v1691_v5  ;;  %v524_v20 = vadd.f32 %v1699_v10, %v519_v14 }
 0x880   :  { %v734_v21 = vmul.f32 %v733_v16, %v733_v16 }
 0x881   :  { %1333 = vmatprep.subr.msk.mxu0 %vm77_vm0, %v524_v20 }
 0x882   :  { %1334 = vmatpush1.msk.msra.mxu0 %vm77_vm0, %v523_v19  ;;  %v736_v23 = vcombine.high %v734_v21, %v734_v21  ;;  %v738_v24 = vsel %vm77_vm0, %v734_v21, 0.0 }
 0x883   :  { %1335 = vmatmul.mubr.msk.f32.vlgmr.msra.gmra.mrb[4].mxu0 %vm125_vm1, %v1709_v22 }
 0x884   :  { %v739_v25 = vsel %vm77_vm0, %v736_v23, 0.0  ;;  %829 = vmatprep.mubr.f32.mxu0 %v1461_v26 }
 0x885   :  { %v740_v27 = vadd.f32 %v739_v25, %v738_v24 }
 0x887   :  { %741 = vadd.xlane.f32.xlu0 %v740_v27 }
 0x914   :  { %v742_v28 = vpop.xlane.xlu0 %741 }
 0x915   :  { %v743_v29 = vrot.slane %v742_v28, 4 }
 0x917   :  { %v744_v1 = vadd.f32 %v743_v29, %v742_v28 }
 0x919   :  { %v745_v30 = vrot.slane %v744_v1, 2 }
 0x91b   :  { %v746_v31 = vadd.f32 %v745_v30, %v744_v1 }
 0x91d   :  { %v747_v34 = vrot.slane %v746_v31, 1 }
 0x91f   :  { %v748_v36 = vadd.f32 %v747_v34, %v746_v31 }
 0x921   :  { %1376 = vpush %v748_v36 }
 0x952   :  { %s1377_s13 = spop %1376 }
 0x953   :  { %s750_s3 = smul.f32 0.0009765625, %s1377_s13 }
 0x955   :  { %s751_s5 = sadd.f32 1e-05, %s750_s3 }
 0x956   :  { %v605_v38 = vpop.f32.mrb[4].mxu0 }
 0x957   :  { %v752_v40 = vstv %s751_s5  ;;  %v606_v42 = vadd.f32 %v605_v38, %v1718_v37  ;;  %v607_v43 = vpop.f32.mrb[5].mxu0 }
 0x958   :  { %1409 = vrsqrt.f32 %v752_v40  ;;  %v608_v44 = vadd.f32 %v607_v43, %v1718_v37 }
 0x959   :  { %v1336_v47 = vmul.f32 -1.442695, %v606_v42 }
 0x95a   :  { %v1337_v48 = vmul.f32 -1.442695, %v608_v44 }
 0x95b   :  { %1411 = vpow2.f32 %v1336_v47 }
 0x95c   :  { %1413 = vpow2.f32 %v1337_v48 }
 0x962   :  { %v1410_v49 = vpop.eup %1409 }
 0x963   :  { %1378 = vpush %v1410_v49 }
 0x965   :  { %v1412_v50 = vpop.eup %1411 }
 0x966   :  { %v1414_v51 = vpop.eup %1413  ;;  %v616_v52 = vadd.f32 1.0, %v1412_v50 }
 0x967   :  { %v617_v53 = vadd.f32 1.0, %v1414_v51 }
 0x969   :  { %1415 = vrcp.f32 %v617_v53 }
 0x96a   :  { %1417 = vrcp.f32 %v616_v52 }
 0x973   :  { %v1416_v54 = vpop.eup %1415 }
 0x974   :  { %v1418_v55 = vpop.eup %1417  ;;  %1338 = vmatprep.subr.msk.mxu1 %vm77_vm0, %v1416_v54 }
 0x975   :  { %1339 = vmatpush1.msk.msra.mxu1 %vm77_vm0, %v1418_v55 }
 0x976   :  { %1340 = vmatmul.mubr.msk.f32.vlgmr.msra.gmra.mrb[4].mxu1 %vm125_vm1, %v1734_v62 }
 0x977   :  { %900 = vmatprep.mubr.f32.mxu1 %v1461_v26 }
 0x994   :  { %s1379_s28 = spop %1378 }
 0x995   :  { %v755_v56 = vstv %s1379_s28 }
 0x996   :  { %v756_v57 = vmul.f32 %v755_v56, %v733_v16 }
 0x998   :  { %v757_v59 = vmul.f32 %v756_v57, %v1583_v32 }
 0x99a   :  { %v758_v60 = vadd.f32 %v757_v59, %v1588_v35 }
 0x99c   :  { %v760_v61 = vcombine.high %v758_v60, %v758_v60 }
 0x99e   :  { %1342 = vmatprep.subr.msk.mxu0 %vm77_vm0, %v760_v61 }
 0x99f   :  { %1343 = vmatpush1.msk.msra.mxu0 %vm77_vm0, %v758_v60  ;;  %v72_v60 = vld [vmem:[%s1830_s16] sm:$0xf] }
 0x9a0   :  { %1344 = vmatmul.mubr.msk.f32.vlgmr.msra.gmra.mrb[6].mxu0 %vm125_vm1, %v1595_v39 }
 0x9a1   :  { %989 = vmatprep.mubr.f32.mxu0 %v1461_v26 }
 0xa49   :  { %v1744_v39 = vpop.f32.mrb[4].mxu1 }
 0xa4a   :  { %v1746_v7 = vpop.f32.mrb[5].mxu1 }
 0xa73   :  { %v831_v32 = vpop.f32.mrb[6].mxu0 }
 0xa74   :  { %v833_v35 = vpop.f32.mrb[7].mxu0  ;;  %v832_v2 = vadd.f32 %v831_v32, %v1602_v41 }
 0xa75   :  { %v834_v63 = vadd.f32 %v833_v35, %v1602_v41 }
 0xa77   :  { %836 = vmatprep.subr.mxu1 %v834_v63 }
 0xa78   :  { %837 = vmatpush1.msra.mxu1 %v832_v2 }
 0xa79   :  { %1345 = vmatmul.mubr.msk.f32.vlgmr.msra.gmra.mrb[6].mxu1 %vm209_vm2, %v1609_v45 }
 0xa7a   :  { %1080 = vmatprep.mubr.f32.mxu1 %v1461_v26 }
 0xb4c   :  { %v902_v8 = vpop.f32.mrb[6].mxu1 }
 0xb4d   :  { %v903_v9 = vadd.f32 %v902_v8, %v1614_v46  ;;  %v904_v13 = vpop.f32.mrb[7].mxu1 }
 0xb4e   :  { %v905_v14 = vadd.f32 %v904_v13, %v1614_v46 }
 0xb4f   :  { %v1346_v15 = vmul.f32 -1.442695, %v903_v9 }
 0xb50   :  { %v1347_v16 = vmul.f32 -1.442695, %v905_v14 }
 0xb51   :  { %1419 = vpow2.f32 %v1346_v15 }
 0xb52   :  { %1421 = vpow2.f32 %v1347_v16 }
 0xb5b   :  { %v1420_v41 = vpop.eup %1419 }
 0xb5c   :  { %v1422_v19 = vpop.eup %1421  ;;  %v913_v20 = vadd.f32 1.0, %v1420_v41 }
 0xb5d   :  { %v914_v45 = vadd.f32 1.0, %v1422_v19 }
 0xb5f   :  { %1423 = vrcp.f32 %v914_v45 }
 0xb60   :  { %1425 = vrcp.f32 %v913_v20 }
 0xb69   :  { %v1424_v21 = vpop.eup %1423 }
 0xb6a   :  { %v1426_v23 = vpop.eup %1425  ;;  %1348 = vmatprep.subr.msk.mxu0 %vm77_vm0, %v1424_v21 }
 0xb6b   :  { %1349 = vmatpush1.msk.msra.mxu0 %vm77_vm0, %v1426_v23 }
 0xb6c   :  { %1350 = vmatmul.mubr.msk.f32.vlgmr.msra.gmra.mrb[8].mxu0 %vm125_vm1, %v1621_v58 }
 0xb6d   :  { %1201 = vmatprep.mubr.f32.mxu0 %v1461_v26 }
 0xc3f   :  { %v991_v46 = vpop.f32.mrb[8].mxu0 }
 0xc40   :  { %v996_v24 = vsel %vm77_vm0, %v991_v46, 0.0  ;;  %v993_v25 = vpop.f32.mrb[9].mxu0 }
 0xc41   :  { %v997_v27 = vsel %vm77_vm0, %v993_v25, 0.0 }
 0xc42   :  { %v998_v28 = vadd.f32 %v997_v27, %v996_v24 }
 0xc44   :  { %999 = vadd.xlane.f32.xlu1 %v998_v28 }
 0xcd1   :  { %v1000_v29 = vpop.xlane.xlu1 %999 }
 0xcd2   :  { %v1001_v1 = vmul.f32 0.00390625, %v1000_v29 }
 0xcd4   :  { %v1002_v30 = vadd.f32 %v1001_v1, %v1633_v3 }
 0xcd6   :  { %1005 = vperm.xlu0 %1392, %v1002_v30  }
 0xd55   :  { %v1006_v31 = vpop.permute.xlu0 %1005 }
 0xd56   :  { %v1008_v34 = vmul.f32 %v1426_v23, %v1006_v31  ;;  %v1009_v36 = vmul.f32 %v1424_v21, %v1006_v31 }
 0xd58   :  { %1351 = vmatprep.subr.msk.mxu1 %vm77_vm0, %v1009_v36 }
 0xd59   :  { %1352 = vmatpush1.msk.msra.mxu1 %vm77_vm0, %v1008_v34 }
 0xd5a   :  { %1353 = vmatmul.mubr.msk.f32.vlgmr.msra.gmra.mrb[8].mxu1 %vm125_vm1, %v1642_v11 }
 0xd5b   :  { %1290 = vmatprep.mubr.f32.mxu1 %v1461_v26 }
 0xe2d   :  { %v1082_v58 = vpop.f32.mrb[8].mxu1 }
 0xe2e   :  { %v1083_v38 = vadd.f32 %v1082_v58, %v1649_v12  ;;  %v1084_v40 = vpop.f32.mrb[9].mxu1 }
 0xe2f   :  { %v1085_v42 = vadd.f32 %v1084_v40, %v1649_v12 }
 0xe30   :  { %v1766_v3 = vadd.f32 %v1666_v0, %v1083_v38 }
 0xe31   :  { %v1769_v43 = vadd.f32 %v1085_v42, %v1672_v33 }
 0xe32   :  { %v1089_v44 = vsel %vm77_vm0, %v1766_v3, 0.0 }
 0xe33   :  { %v1090_v11 = vsel %vm77_vm0, %v1769_v43, 0.0 }
 0xe34   :  { %v1091_v47 = vadd.f32 %v1090_v11, %v1089_v44 }
 0xe36   :  { %1092 = vadd.xlane.f32.xlu0 %v1091_v47 }
 0xec3   :  { %v1093_v26 = vpop.xlane.xlu0 %1092 }
 0xec4   :  { %v1094_v48 = vrot.slane %v1093_v26, 4 }
 0xec6   :  { %v1095_v49 = vadd.f32 %v1094_v48, %v1093_v26 }
 0xec8   :  { %v1096_v50 = vrot.slane %v1095_v49, 2 }
 0xeca   :  { %v1097_v51 = vadd.f32 %v1096_v50, %v1095_v49 }
 0xecc   :  { %v1098_v12 = vrot.slane %v1097_v51, 1 }
 0xece   :  { %v1099_v52 = vadd.f32 %v1098_v12, %v1097_v51 }
 0xed0   :  { %1380 = vpush %v1099_v52 }
 0xf01   :  { %s1381_s15 = spop %1380 }
 0xf02   :  { %s1101_s0 = smul.f32 0.0009765625, %s1381_s15 }
 0xf04   :  { %v1102_v0 = vstv %s1101_s0 }
 0xf05   :  { %v1103_v33 = vsub.f32 %v1766_v3, %v1102_v0  ;;  %v1104_v53 = vsub.f32 %v1769_v43, %v1102_v0 }
 0xf07   :  { %v1105_v54 = vmul.f32 %v1103_v33, %v1103_v33  ;;  %v1106_v55 = vmul.f32 %v1104_v53, %v1104_v53 }
 0xf09   :  { %v1107_v56 = vsel %vm77_vm0, %v1105_v54, 0.0  ;;  %v1108_v57 = vsel %vm77_vm0, %v1106_v55, 0.0 }
 0xf0a   :  { %v1109_v59 = vadd.f32 %v1108_v57, %v1107_v56 }
 0xf0c   :  { %1110 = vadd.xlane.f32.xlu1 %v1109_v59 }
 0xf1d   :  { %624 = vperm.xlu1 %1391, %v72_v60  }
 0xf99   :  { %v1111_v61 = vpop.xlane.xlu1 %1110 }
 0xf9a   :  { %v1112_v32 = vrot.slane %v1111_v61, 4 }
 0xf9c   :  { %v1113_v35 = vadd.f32 %v1112_v32, %v1111_v61 }
 0xf9d   :  { %v625_v63 = vpop.permute.xlu1 %624 }
 0xf9e   :  { %v1114_v2 = vrot.slane %v1113_v35, 2  ;;  %v703_v8 = vadd.f32 %v1744_v39, %v625_v63  ;;  %v705_v9 = vadd.f32 %v1746_v7, %v625_v63 }
 0xfa0   :  { %v707_v13 = vadd.f32 %v703_v8, %v1654_v17  ;;  %v708_v14 = vadd.f32 %v705_v9, %v1657_v18  ;;  %v1115_v15 = vadd.f32 %v1114_v2, %v1113_v35 }
 0xfa2   :  { %v711_v16 = vcombine.low %v707_v13, %v708_v14  ;;  %v1116_v41 = vrot.slane %v1115_v15, 1 }
 0xfa4   :  { %713 = vst [vmem:[#allocation2] sm:$0xff] %v711_v16  ;;  %v1117_v19 = vadd.f32 %v1116_v41, %v1115_v15 }
 0xfa6   :  { %1382 = vpush %v1117_v19 }
 0xfd7   :  { %s1383_s16 = spop %1382 }
 0xfd8   :  { %s1119_s19 = smul.f32 0.0009765625, %s1383_s16 }
 0xfda   :  { %s1120_s8 = sadd.f32 1e-05, %s1119_s19 }
 0xfdc   :  { %v1121_v20 = vstv %s1120_s8 }
 0xfdd   :  { %1427 = vrsqrt.f32 %v1121_v20 }
 0xfe7   :  { %v1428_v45 = vpop.eup %1427 }
 0xfe8   :  { %1384 = vpush %v1428_v45 }
0x1019   :  { %s1385_s9 = spop %1384 }
0x101a   :  { %v1124_v39 = vstv %s1385_s9 }
0x101b   :  { %v1125_v7 = vmul.f32 %v1124_v39, %v1103_v33  ;;  %v1126_v21 = vmul.f32 %v1124_v39, %v1104_v53 }
0x101d   :  { %v1127_v17 = vmul.f32 %v1125_v7, %v1686_v4  ;;  %v1128_v18 = vmul.f32 %v1126_v21, %v1695_v6 }
0x101f   :  { %v1129_v23 = vadd.f32 %v1127_v17, %v1691_v5  ;;  %v1130_v46 = vadd.f32 %v1128_v18, %v1699_v10 }
0x1021   :  { %1354 = vmatprep.subr.msk.mxu0 %vm77_vm0, %v1130_v46 }
0x1022   :  { %1355 = vmatpush1.msk.msra.mxu0 %vm77_vm0, %v1129_v23 }
0x1023   :  { %1356 = vmatmul.mubr.msk.f32.vlgmr.msra.gmra.mrb[10].mxu0 %vm125_vm1, %v1709_v22 }
0x10f6   :  { %v1203_v24 = vpop.f32.mrb[10].mxu0 }
0x10f7   :  { %v1204_v25 = vadd.f32 %v1203_v24, %v1718_v37  ;;  %v1205_v27 = vpop.f32.mrb[11].mxu0 }
0x10f8   :  { %v1206_v28 = vadd.f32 %v1205_v27, %v1718_v37 }
0x10f9   :  { %v1357_v4 = vmul.f32 -1.442695, %v1204_v25 }
0x10fa   :  { %v1358_v29 = vmul.f32 -1.442695, %v1206_v28 }
0x10fb   :  { %1429 = vpow2.f32 %v1357_v4 }
0x10fc   :  { %1431 = vpow2.f32 %v1358_v29 }
0x1105   :  { %v1430_v5 = vpop.eup %1429 }
0x1106   :  { %v1432_v6 = vpop.eup %1431  ;;  %v1214_v10 = vadd.f32 1.0, %v1430_v5 }
0x1107   :  { %v1215_v1 = vadd.f32 1.0, %v1432_v6 }
0x1109   :  { %1433 = vrcp.f32 %v1215_v1 }
0x110a   :  { %1435 = vrcp.f32 %v1214_v10 }
0x1113   :  { %v1434_v30 = vpop.eup %1433 }
0x1114   :  { %v1436_v31 = vpop.eup %1435  ;;  %1359 = vmatprep.subr.msk.mxu1 %vm77_vm0, %v1434_v30 }
0x1115   :  { %1360 = vmatpush1.msk.msra.mxu1 %vm77_vm0, %v1436_v31 }
0x1116   :  { %1361 = vmatmul.mubr.msk.f32.vlgmr.msra.gmra.mrb[10].mxu1 %vm125_vm1, %v1734_v62 }
0x11e9   :  { %v1292_v22 = vpop.f32.mrb[10].mxu1 }
0x11ea   :  { %v1293_v37 = vadd.f32 %v1292_v22, %v625_v63  ;;  %v1294_v34 = vpop.f32.mrb[11].mxu1 }
0x11eb   :  { %v1295_v36 = vadd.f32 %v1294_v34, %v625_v63 }
0x11ec   :  { %v1297_v58 = vadd.f32 %v1293_v37, %v1766_v3 }
0x11ed   :  { %v1298_v38 = vadd.f32 %v1295_v36, %v1769_v43 }
0x11ef   :  { %v1301_v40 = vcombine.low %v1297_v58, %v1298_v38 }
0x11f1   :  { %1304 = vst [vmem:[#allocation2 + $0x8] sm:$0xff] %v1301_v40 }
0x11f2   :  { %1448 = shalt.err (!%p1445_p4)
}
0x11f3   :  { %s1449_s22 = scalar_lea.hbm %s1831_s17, 256 }
0x11f4   :  { %p1450_p5 = scmp.ne.s32.totalorder %s1831_s17, %s1449_s22  ;;  %p1453_p6 = scmp.lt.u32.totalorder %s1449_s22, %s1831_s17 }
0x11f6   :  { %p1455_p7 = pnand %p1453_p6, %p1450_p5 }
0x11f8   :  { %1458 = shalt.err (!%p1455_p7)
}
0x11f9   :  { %s1464_s25 = smov 128   ;;  %s1465_s6 = smov 8  }
0x11fa   :  { %1316 = dma.vmem_to_hbm [thread:$0]  %s1311_s1, 256, %s1831_s17, [#allocation3], %s1464_s25, %s1464_s25, %s1465_s6  }
0x11fb   :  { %1459 = dma.done.wait [#allocation3], 256  }
0x11fc   :  { %1460 = vsyncadd [#allocation3], 4294967040 }
0x11fd   :  { %1320 = vsyncpa [#allocation3], 1 }

// kernel: tpu_custom_call.1
= control target key start
LH: loop header
LB: loop body
LE: loop exit
PB: predicated region body
PF: predicated region fallthrough
CT: control target
= control target key end

     0   :  { %s1814_s0 = inlined_call_operand.vmem [shape: f32[2,4,256], index: 0, kind: input, shape index: {}]   ;;  %s1815_s1 = inlined_call_operand.vmem [shape: f32[4,256], index: 1, kind: input, shape index: {}]   ;;  %s1816_s2 = inlined_call_operand.vmem [shape: f32[4,256], index: 2, kind: input, shape index: {}]   ;;  %s1817_s3 = inlined_call_operand.vmem [shape: f32[8,4], index: 3, kind: input, shape index: {}]   ;;  %s1818_s4 = inlined_call_operand.vmem [shape: f32[8,1], index: 4, kind: input, shape index: {}]   ;;  %s1819_s5 = inlined_call_operand.vmem [shape: f32[4,8], index: 5, kind: input, shape index: {}]   ;;  %s1820_s6 = inlined_call_operand.vmem [shape: f32[4,1], index: 6, kind: input, shape index: {}]   ;;  %s1821_s7 = inlined_call_operand.vmem [shape: f32[4,4], index: 7, kind: input, shape index: {}]   ;;  %s1822_s8 = inlined_call_operand.vmem [shape: f32[4,1], index: 8, kind: input, shape index: {}]   ;;  %s1823_s9 = inlined_call_operand.vmem [shape: f32[4,4], index: 9, kind: input, shape index: {}]   ;;  %s1824_s10 = inlined_call_operand.vmem [shape: f32[4,1], index: 10, kind: input, shape index: {}]   ;;  %s1825_s11 = inlined_call_operand.vmem [shape: f32[4,256], index: 11, kind: input, shape index: {}]   ;;  %s1826_s12 = inlined_call_operand.vmem [shape: f32[4,256], index: 12, kind: input, shape index: {}]   ;;  %s1827_s13 = inlined_call_operand.vmem [shape: f32[4,4], index: 13, kind: input, shape index: {}]   ;;  %s1828_s14 = inlined_call_operand.vmem [shape: f32[4,1], index: 14, kind: input, shape index: {}]   ;;  %s1829_s15 = inlined_call_operand.vmem [shape: f32[4,4], index: 15, kind: input, shape index: {}]   ;;  %s1830_s16 = inlined_call_operand.vmem [shape: f32[4,1], index: 16, kind: input, shape index: {}]   ;;  %s1831_s17 = inlined_call_operand.hbm [shape: f32[2,4,256], index: 17, kind: output, shape index: {}]  }
   0x1   :  { %1833 = sst [smem:[#allocation5_spill]] %s1814_s0 }
   0x2   :  { %1834 = sst [smem:[#allocation6_spill]] %s1815_s1 }
   0x3   :  { %s1835_s26 = sld [smem:[#allocation5_spill]]  ;;  %vm77_vm0 = vcmask 1043456  }
   0x9   :  { %v1559_v0 = vld [vmem:[%s1835_s26] sm:$0xff] }
   0xa   :  { %22 = vsyncpa [#allocation3], 0  ;;  %v1563_v1 = vcombine.high %v1559_v0, %v1559_v0  ;;  %v78_v2 = vsel %vm77_vm0, %v1559_v0, 0.0  ;;  %v1461_v26 = vmov 0.0   ;;  %v60_v27 = vld [vmem:[%s1818_s4] sm:$0xff]  ;;  %v1462_v28 = vmov 0  }
   0xb   :  { %197 = vmatprep.mubr.f32.mxu0 %v1461_v26  ;;  %277 = vmatprep.mubr.f32.mxu1 %v1461_v26  ;;  %v62_v29 = vld [vmem:[%s1820_s6] sm:$0xf]  ;;  %s1836_s23 = sld [smem:[#allocation6_spill]]  ;;  %vm125_vm1 = vcmask 31744   ;;  %vm209_vm2 = vcmask 64512  }
   0xc   :  { %v79_v3 = vsel %vm77_vm0, %v1563_v1, 0.0  ;;  %1391 = vset.pattern.permute.xlu1 %v1462_v28  ;;  %1392 = vset.pattern.permute.xlu0 %v1462_v28  ;;  %v1588_v35 = vld [vmem:[%s1816_s2] sm:$0xff] }
   0xd   :  { %v80_v4 = vadd.f32 %v79_v3, %v78_v2  ;;  %120 = vperm.xlu1 %1391, %v60_v27   ;;  %v1595_v39 = vld [vmem:[%s1817_s3] sm:$0xff] }
   0xe   :  { %v1609_v45 = vld [vmem:[%s1819_s5] sm:$0xf] }
   0xf   :  { %81 = vadd.xlane.f32.xlu0 %v80_v4  ;;  %v1621_v58 = vld [vmem:[%s1821_s7] sm:$0xf] }
  0x10   :  { %v1633_v3 = vld [vmem:[%s1822_s8] sm:$0xf] }
  0x11   :  { %206 = vperm.xlu1 %1391, %v62_v29   ;;  %v1583_v32 = vld [vmem:[%s1836_s23] sm:$0xff] }
  0x8c   :  { %v1602_v41 = vpop.permute.xlu1 %120 }
  0x90   :  { %v1614_v46 = vpop.permute.xlu1 %206 }
  0x9c   :  { %v82_v5 = vpop.xlane.xlu0 %81 }
  0x9d   :  { %v83_v6 = vrot.slane %v82_v5, 4 }
  0x9f   :  { %v84_v7 = vadd.f32 %v83_v6, %v82_v5 }
  0xa1   :  { %v85_v8 = vrot.slane %v84_v7, 2 }
  0xa3   :  { %v86_v9 = vadd.f32 %v85_v8, %v84_v7  ;;  %v66_v7 = vld [vmem:[%s1824_s10] sm:$0xf]  ;;  %s1463_s10 = smov [#allocation2]  }
  0xa5   :  { %v87_v10 = vrot.slane %v86_v9, 1 }
  0xa7   :  { %v88_v11 = vadd.f32 %v87_v10, %v86_v9 }
  0xa9   :  { %1362 = vpush %v88_v11  ;;  %v1642_v11 = vld [vmem:[%s1823_s9] sm:$0xf] }
  0xda   :  { %s1363_s27 = spop %1362 }
  0xdb   :  { %s90_s28 = smul.f32 0.0009765625, %s1363_s27 }
  0xdd   :  { %v91_v12 = vstv %s90_s28 }
  0xde   :  { %v92_v13 = vsub.f32 %v1559_v0, %v91_v12 }
  0xe0   :  { %v93_v14 = vmul.f32 %v92_v13, %v92_v13 }
  0xe2   :  { %v95_v15 = vcombine.high %v93_v14, %v93_v14  ;;  %v97_v16 = vsel %vm77_vm0, %v93_v14, 0.0 }
  0xe4   :  { %v98_v17 = vsel %vm77_vm0, %v95_v15, 0.0 }
  0xe5   :  { %v99_v18 = vadd.f32 %v98_v17, %v97_v16 }
  0xe7   :  { %100 = vadd.xlane.f32.xlu0 %v99_v18 }
 0x174   :  { %v101_v19 = vpop.xlane.xlu0 %100 }
 0x175   :  { %v102_v20 = vrot.slane %v101_v19, 4 }
 0x177   :  { %v103_v21 = vadd.f32 %v102_v20, %v101_v19 }
 0x179   :  { %v104_v22 = vrot.slane %v103_v21, 2 }
 0x17b   :  { %v105_v23 = vadd.f32 %v104_v22, %v103_v21 }
 0x17d   :  { %v106_v24 = vrot.slane %v105_v23, 1 }
 0x17f   :  { %v107_v25 = vadd.f32 %v106_v24, %v105_v23 }
 0x181   :  { %1364 = vpush %v107_v25 }
 0x1b2   :  { %s1365_s19 = spop %1364 }
 0x1b3   :  { %s109_s1 = smul.f32 0.0009765625, %s1365_s19 }
 0x1b5   :  { %s110_s20 = sadd.f32 1e-05, %s109_s1  ;;  %s1310_s1 = sshll.u32 %s1463_s10, 4  ;;  %s1311_s1 = int_to_ptr.vmem [resolvable:$true] %s1310_s1 }
 0x1b6   :  { %p1442_p1 = scmp.lt.s32.totalorder %s1311_s1, %s1311_s1 }
 0x1b7   :  { %v111_v30 = vstv %s110_s20 }
 0x1b8   :  { %1397 = vrsqrt.f32 %v111_v30 }
 0x1c2   :  { %v1398_v31 = vpop.eup %1397 }
 0x1c3   :  { %1366 = vpush %v1398_v31 }
 0x1f4   :  { %s1367_s21 = spop %1366 }
 0x1f5   :  { %v114_v33 = vstv %s1367_s21 }
 0x1f6   :  { %v115_v34 = vmul.f32 %v114_v33, %v92_v13 }
 0x1f8   :  { %v116_v36 = vmul.f32 %v115_v34, %v1583_v32 }
 0x1fa   :  { %v117_v37 = vadd.f32 %v116_v36, %v1588_v35 }
 0x1fc   :  { %v124_v38 = vcombine.high %v117_v37, %v117_v37 }
 0x1fe   :  { %1321 = vmatprep.subr.msk.mxu0 %vm77_vm0, %v124_v38 }
 0x1ff   :  { %1322 = vmatpush1.msk.msra.mxu0 %vm77_vm0, %v117_v37 }
 0x200   :  { %1323 = vmatmul.mubr.msk.f32.vlgmr.msra.gmra.mrb[0].mxu0 %vm125_vm1, %v1595_v39 }
 0x201   :  { %369 = vmatprep.mubr.f32.mxu0 %v1461_v26 }
 0x2d3   :  { %v199_v40 = vpop.f32.mrb[0].mxu0 }
 0x2d4   :  { %v201_v42 = vpop.f32.mrb[1].mxu0  ;;  %v200_v44 = vadd.f32 %v199_v40, %v1602_v41 }
 0x2d5   :  { %v202_v43 = vadd.f32 %v201_v42, %v1602_v41 }
 0x2d7   :  { %213 = vmatprep.subr.mxu1 %v202_v43 }
 0x2d8   :  { %214 = vmatpush1.msra.mxu1 %v200_v44 }
 0x2d9   :  { %1324 = vmatmul.mubr.msk.f32.vlgmr.msra.gmra.mrb[0].mxu1 %vm209_vm2, %v1609_v45 }
 0x2da   :  { %468 = vmatprep.mubr.f32.mxu1 %v1461_v26 }
 0x3ac   :  { %v279_v47 = vpop.f32.mrb[0].mxu1 }
 0x3ad   :  { %v280_v48 = vadd.f32 %v279_v47, %v1614_v46  ;;  %v281_v49 = vpop.f32.mrb[1].mxu1  ;;  %v70_v47 = vld [vmem:[%s1828_s14] sm:$0xf] }
 0x3ae   :  { %v282_v50 = vadd.f32 %v281_v49, %v1614_v46 }
 0x3af   :  { %v1325_v51 = vmul.f32 -1.442695, %v280_v48 }
 0x3b0   :  { %v1326_v52 = vmul.f32 -1.442695, %v282_v50 }
 0x3b1   :  { %1399 = vpow2.f32 %v1325_v51 }
 0x3b2   :  { %1401 = vpow2.f32 %v1326_v52 }
 0x3bb   :  { %v1400_v53 = vpop.eup %1399 }
 0x3bc   :  { %v1402_v54 = vpop.eup %1401  ;;  %v290_v55 = vadd.f32 1.0, %v1400_v53 }
 0x3bd   :  { %v291_v56 = vadd.f32 1.0, %v1402_v54 }
 0x3bf   :  { %1403 = vrcp.f32 %v291_v56 }
 0x3c0   :  { %1405 = vrcp.f32 %v290_v55 }
 0x3c9   :  { %v1404_v57 = vpop.eup %1403 }
 0x3ca   :  { %v1406_v59 = vpop.eup %1405  ;;  %1327 = vmatprep.subr.msk.mxu0 %vm77_vm0, %v1404_v57 }
 0x3cb   :  { %1328 = vmatpush1.msk.msra.mxu0 %vm77_vm0, %v1406_v59 }
 0x3cc   :  { %1329 = vmatmul.mubr.msk.f32.vlgmr.msra.gmra.mrb[2].mxu0 %vm125_vm1, %v1621_v58 }
 0x3cd   :  { %603 = vmatprep.mubr.f32.mxu0 %v1461_v26 }
 0x49f   :  { %v371_v60 = vpop.f32.mrb[2].mxu0 }
 0x4a0   :  { %v376_v61 = vsel %vm77_vm0, %v371_v60, 0.0  ;;  %v373_v62 = vpop.f32.mrb[3].mxu0 }
 0x4a1   :  { %v377_v63 = vsel %vm77_vm0, %v373_v62, 0.0 }
 0x4a2   :  { %v378_v2 = vadd.f32 %v377_v63, %v376_v61 }
 0x4a4   :  { %379 = vadd.xlane.f32.xlu0 %v378_v2 }
 0x4ba   :  { %392 = vperm.xlu0 %1392, %v66_v7  }
 0x531   :  { %v380_v4 = vpop.xlane.xlu0 %379 }
 0x532   :  { %v381_v5 = vmul.f32 0.00390625, %v380_v4  ;;  %v1686_v4 = vld [vmem:[%s1825_s11] sm:$0xff] }
 0x534   :  { %v382_v6 = vadd.f32 %v381_v5, %v1633_v3  ;;  %v1691_v5 = vld [vmem:[%s1826_s12] sm:$0xff] }
 0x536   :  { %385 = vperm.xlu1 %1391, %v382_v6   ;;  %v1695_v6 = vcombine.high %v1686_v4, %v1686_v4 }
 0x539   :  { %v1649_v12 = vpop.permute.xlu0 %392 }
 0x5b5   :  { %v386_v8 = vpop.permute.xlu1 %385 }
 0x5b6   :  { %v388_v9 = vmul.f32 %v1406_v59, %v386_v8  ;;  %v389_v10 = vmul.f32 %v1404_v57, %v386_v8 }
 0x5b8   :  { %1330 = vmatprep.subr.msk.mxu1 %vm77_vm0, %v389_v10  ;;  %v1699_v10 = vcombine.high %v1691_v5, %v1691_v5 }
 0x5b9   :  { %1331 = vmatpush1.msk.msra.mxu1 %vm77_vm0, %v388_v9 }
 0x5ba   :  { %1332 = vmatmul.mubr.msk.f32.vlgmr.msra.gmra.mrb[2].mxu1 %vm125_vm1, %v1642_v11 }
 0x5bb   :  { %700 = vmatprep.mubr.f32.mxu1 %v1461_v26 }
 0x68d   :  { %v470_v13 = vpop.f32.mrb[2].mxu1 }
 0x68e   :  { %v471_v14 = vadd.f32 %v470_v13, %v1649_v12  ;;  %v472_v15 = vpop.f32.mrb[3].mxu1 }
 0x68f   :  { %v473_v16 = vadd.f32 %v472_v15, %v1649_v12 }
 0x690   :  { %v1654_v17 = vadd.f32 %v471_v14, %v1559_v0  ;;  %v1666_v0 = vld [vmem:[%s1835_s26 + $0x8] sm:$0xff]  ;;  %s1437_s26 = scalar_lea.vmem %s1311_s1, 256 }
 0x691   :  { %v1657_v18 = vadd.f32 %v473_v16, %v1563_v1  ;;  %v1672_v33 = vcombine.high %v1666_v0, %v1666_v0  ;;  %v719_v40 = vsel %vm77_vm0, %v1666_v0, 0.0  ;;  %p1438_p0 = scmp.ne.s32.totalorder %s1311_s1, %s1437_s26  ;;  %p1443_p2 = scmp.lt.s32.totalorder %s1437_s26, %s1437_s26 }
 0x692   :  { %v477_v19 = vsel %vm77_vm0, %v1654_v17, 0.0 }
 0x693   :  { %v478_v20 = vsel %vm77_vm0, %v1657_v18, 0.0  ;;  %v720_v42 = vsel %vm77_vm0, %v1672_v33, 0.0  ;;  %p1444_p3 = por %p1443_p2, %p1442_p1 }
 0x694   :  { %v479_v21 = vadd.f32 %v478_v20, %v477_v19  ;;  %v721_v44 = vadd.f32 %v720_v42, %v719_v40 }
 0x695   :  { %p1445_p4 = pnand %p1444_p3, %p1438_p0 }
 0x696   :  { %480 = vadd.xlane.f32.xlu1 %v479_v21 }
 0x723   :  { %v481_v22 = vpop.xlane.xlu1 %480 }
 0x724   :  { %v482_v23 = vrot.slane %v481_v22, 4 }
 0x726   :  { %v483_v24 = vadd.f32 %v482_v23, %v481_v22  ;;  %v1709_v22 = vld [vmem:[%s1827_s13] sm:$0xf] }
 0x728   :  { %v484_v25 = vrot.slane %v483_v24, 2 }
 0x72a   :  { %v485_v27 = vadd.f32 %v484_v25, %v483_v24 }
 0x72c   :  { %v486_v28 = vrot.slane %v485_v27, 1 }
 0x72e   :  { %v487_v29 = vadd.f32 %v486_v28, %v485_v27 }
 0x730   :  { %1368 = vpush %v487_v29 }
 0x761   :  { %s1369_s8 = spop %1368 }
 0x762   :  { %s489_s9 = smul.f32 0.0009765625, %s1369_s8 }
 0x764   :  { %v490_v1 = vstv %s489_s9 }
 0x765   :  { %v491_v30 = vsub.f32 %v1654_v17, %v490_v1  ;;  %v492_v31 = vsub.f32 %v1657_v18, %v490_v1 }
 0x767   :  { %v493_v34 = vmul.f32 %v491_v30, %v491_v30  ;;  %v494_v36 = vmul.f32 %v492_v31, %v492_v31 }
 0x769   :  { %v495_v37 = vsel %vm77_vm0, %v493_v34, 0.0  ;;  %v496_v38 = vsel %vm77_vm0, %v494_v36, 0.0 }
 0x76a   :  { %v497_v43 = vadd.f32 %v496_v38, %v495_v37 }
 0x76c   :  { %498 = vadd.xlane.f32.xlu1 %v497_v43 }
 0x770   :  { %722 = vadd.xlane.f32.xlu1 %v721_v44 }
 0x781   :  { %527 = vperm.xlu1 %1391, %v70_v47  }
 0x7f9   :  { %v499_v48 = vpop.xlane.xlu1 %498 }
 0x7fa   :  { %v500_v49 = vrot.slane %v499_v48, 4 }
 0x7fc   :  { %v501_v50 = vadd.f32 %v500_v49, %v499_v48 }
 0x7fd   :  { %v723_v55 = vpop.xlane.xlu1 %722 }
 0x7fe   :  { %v502_v51 = vrot.slane %v501_v50, 2  ;;  %v724_v56 = vrot.slane %v723_v55, 4 }
 0x800   :  { %v503_v52 = vadd.f32 %v502_v51, %v501_v50  ;;  %v725_v57 = vadd.f32 %v724_v56, %v723_v55 }
 0x801   :  { %v1718_v37 = vpop.permute.xlu1 %527 }
 0x802   :  { %v504_v53 = vrot.slane %v503_v52, 1  ;;  %v726_v59 = vrot.slane %v725_v57, 2 }
 0x804   :  { %v505_v54 = vadd.f32 %v504_v53, %v503_v52  ;;  %v727_v61 = vadd.f32 %v726_v59, %v725_v57 }
 0x806   :  { %1370 = vpush %v505_v54  ;;  %v728_v62 = vrot.slane %v727_v61, 1 }
 0x808   :  { %v729_v2 = vadd.f32 %v728_v62, %v727_v61  ;;  %v1734_v62 = vld [vmem:[%s1829_s15] sm:$0xf] }
 0x837   :  { %s1371_s21 = spop %1370 }
 0x838   :  { %s507_s22 = smul.f32 0.0009765625, %s1371_s21 }
 0x83a   :  { %s508_s4 = sadd.f32 1e-05, %s507_s22 }
 0x83c   :  { %v509_v60 = vstv %s508_s4 }
 0x83d   :  { %1407 = vrsqrt.f32 %v509_v60 }
 0x847   :  { %v1408_v63 = vpop.eup %1407 }
 0x848   :  { %1372 = vpush %v1408_v63 }
 0x849   :  { %1374 = vpush %v729_v2 }
 0x879   :  { %s1373_s6 = spop %1372 }
 0x87a   :  { %v512_v7 = vstv %s1373_s6  ;;  %s1375_s27 = spop %1374 }
 0x87b   :  { %v513_v8 = vmul.f32 %v512_v7, %v491_v30  ;;  %v514_v9 = vmul.f32 %v512_v7, %v492_v31  ;;  %s731_s11 = smul.f32 0.0009765625, %s1375_s27 }
 0x87d   :  { %v518_v13 = vmul.f32 %v513_v8, %v1686_v4  ;;  %v519_v14 = vmul.f32 %v1695_v6, %v514_v9  ;;  %v732_v15 = vstv %s731_s11 }
 0x87e   :  { %v733_v16 = vsub.f32 %v1666_v0, %v732_v15 }
 0x87f   :  { %v523_v19 = vadd.f32 %v518_v13, %v1691_v5  ;;  %v524_v20 = vadd.f32 %v1699_v10, %v519_v14 }
 0x880   :  { %v734_v21 = vmul.f32 %v733_v16, %v733_v16 }
 0x881   :  { %1333 = vmatprep.subr.msk.mxu0 %vm77_vm0, %v524_v20 }
 0x882   :  { %1334 = vmatpush1.msk.msra.mxu0 %vm77_vm0, %v523_v19  ;;  %v736_v23 = vcombine.high %v734_v21, %v734_v21  ;;  %v738_v24 = vsel %vm77_vm0, %v734_v21, 0.0 }
 0x883   :  { %1335 = vmatmul.mubr.msk.f32.vlgmr.msra.gmra.mrb[4].mxu0 %vm125_vm1, %v1709_v22 }
 0x884   :  { %v739_v25 = vsel %vm77_vm0, %v736_v23, 0.0  ;;  %829 = vmatprep.mubr.f32.mxu0 %v1461_v26 }
 0x885   :  { %v740_v27 = vadd.f32 %v739_v25, %v738_v24 }
 0x887   :  { %741 = vadd.xlane.f32.xlu0 %v740_v27 }
 0x914   :  { %v742_v28 = vpop.xlane.xlu0 %741 }
 0x915   :  { %v743_v29 = vrot.slane %v742_v28, 4 }
 0x917   :  { %v744_v1 = vadd.f32 %v743_v29, %v742_v28 }
 0x919   :  { %v745_v30 = vrot.slane %v744_v1, 2 }
 0x91b   :  { %v746_v31 = vadd.f32 %v745_v30, %v744_v1 }
 0x91d   :  { %v747_v34 = vrot.slane %v746_v31, 1 }
 0x91f   :  { %v748_v36 = vadd.f32 %v747_v34, %v746_v31 }
 0x921   :  { %1376 = vpush %v748_v36 }
 0x952   :  { %s1377_s13 = spop %1376 }
 0x953   :  { %s750_s3 = smul.f32 0.0009765625, %s1377_s13 }
 0x955   :  { %s751_s5 = sadd.f32 1e-05, %s750_s3 }
 0x956   :  { %v605_v38 = vpop.f32.mrb[4].mxu0 }
 0x957   :  { %v752_v40 = vstv %s751_s5  ;;  %v606_v42 = vadd.f32 %v605_v38, %v1718_v37  ;;  %v607_v43 = vpop.f32.mrb[5].mxu0 }
 0x958   :  { %1409 = vrsqrt.f32 %v752_v40  ;;  %v608_v44 = vadd.f32 %v607_v43, %v1718_v37 }
 0x959   :  { %v1336_v47 = vmul.f32 -1.442695, %v606_v42 }
 0x95a   :  { %v1337_v48 = vmul.f32 -1.442695, %v608_v44 }
 0x95b   :  { %1411 = vpow2.f32 %v1336_v47 }
 0x95c   :  { %1413 = vpow2.f32 %v1337_v48 }
 0x962   :  { %v1410_v49 = vpop.eup %1409 }
 0x963   :  { %1378 = vpush %v1410_v49 }
 0x965   :  { %v1412_v50 = vpop.eup %1411 }
 0x966   :  { %v1414_v51 = vpop.eup %1413  ;;  %v616_v52 = vadd.f32 1.0, %v1412_v50 }
 0x967   :  { %v617_v53 = vadd.f32 1.0, %v1414_v51 }
 0x969   :  { %1415 = vrcp.f32 %v617_v53 }
 0x96a   :  { %1417 = vrcp.f32 %v616_v52 }
 0x973   :  { %v1416_v54 = vpop.eup %1415 }
 0x974   :  { %v1418_v55 = vpop.eup %1417  ;;  %1338 = vmatprep.subr.msk.mxu1 %vm77_vm0, %v1416_v54 }
 0x975   :  { %1339 = vmatpush1.msk.msra.mxu1 %vm77_vm0, %v1418_v55 }
 0x976   :  { %1340 = vmatmul.mubr.msk.f32.vlgmr.msra.gmra.mrb[4].mxu1 %vm125_vm1, %v1734_v62 }
 0x977   :  { %900 = vmatprep.mubr.f32.mxu1 %v1461_v26 }
 0x994   :  { %s1379_s28 = spop %1378 }
 0x995   :  { %v755_v56 = vstv %s1379_s28 }
 0x996   :  { %v756_v57 = vmul.f32 %v755_v56, %v733_v16 }
 0x998   :  { %v757_v59 = vmul.f32 %v756_v57, %v1583_v32 }
 0x99a   :  { %v758_v60 = vadd.f32 %v757_v59, %v1588_v35 }
 0x99c   :  { %v760_v61 = vcombine.high %v758_v60, %v758_v60 }
 0x99e   :  { %1342 = vmatprep.subr.msk.mxu0 %vm77_vm0, %v760_v61 }
 0x99f   :  { %1343 = vmatpush1.msk.msra.mxu0 %vm77_vm0, %v758_v60  ;;  %v72_v60 = vld [vmem:[%s1830_s16] sm:$0xf] }
 0x9a0   :  { %1344 = vmatmul.mubr.msk.f32.vlgmr.msra.gmra.mrb[6].mxu0 %vm125_vm1, %v1595_v39 }
 0x9a1   :  { %989 = vmatprep.mubr.f32.mxu0 %v1461_v26 }
 0xa49   :  { %v1744_v39 = vpop.f32.mrb[4].mxu1 }
 0xa4a   :  { %v1746_v7 = vpop.f32.mrb[5].mxu1 }
 0xa73   :  { %v831_v32 = vpop.f32.mrb[6].mxu0 }
 0xa74   :  { %v833_v35 = vpop.f32.mrb[7].mxu0  ;;  %v832_v2 = vadd.f32 %v831_v32, %v1602_v41 }
 0xa75   :  { %v834_v63 = vadd.f32 %v833_v35, %v1602_v41 }
 0xa77   :  { %836 = vmatprep.subr.mxu1 %v834_v63 }
 0xa78   :  { %837 = vmatpush1.msra.mxu1 %v832_v2 }
 0xa79   :  { %1345 = vmatmul.mubr.msk.f32.vlgmr.msra.gmra.mrb[6].mxu1 %vm209_vm2, %v1609_v45 }
 0xa7a   :  { %1080 = vmatprep.mubr.f32.mxu1 %v1461_v26 }
 0xb4c   :  { %v902_v8 = vpop.f32.mrb[6].mxu1 }
 0xb4d   :  { %v903_v9 = vadd.f32 %v902_v8, %v1614_v46  ;;  %v904_v13 = vpop.f32.mrb[7].mxu1 }
 0xb4e   :  { %v905_v14 = vadd.f32 %v904_v13, %v1614_v46 }
 0xb4f   :  { %v1346_v15 = vmul.f32 -1.442695, %v903_v9 }
 0xb50   :  { %v1347_v16 = vmul.f32 -1.442695, %v905_v14 }
 0xb51   :  { %1419 = vpow2.f32 %v1346_v15 }
 0xb52   :  { %1421 = vpow2.f32 %v1347_v16 }
 0xb5b   :  { %v1420_v41 = vpop.eup %1419 }
 0xb5c   :  { %v1422_v19 = vpop.eup %1421  ;;  %v913_v20 = vadd.f32 1.0, %v1420_v41 }
 0xb5d   :  { %v914_v45 = vadd.f32 1.0, %v1422_v19 }
 0xb5f   :  { %1423 = vrcp.f32 %v914_v45 }
 0xb60   :  { %1425 = vrcp.f32 %v913_v20 }
 0xb69   :  { %v1424_v21 = vpop.eup %1423 }
 0xb6a   :  { %v1426_v23 = vpop.eup %1425  ;;  %1348 = vmatprep.subr.msk.mxu0 %vm77_vm0, %v1424_v21 }
 0xb6b   :  { %1349 = vmatpush1.msk.msra.mxu0 %vm77_vm0, %v1426_v23 }
 0xb6c   :  { %1350 = vmatmul.mubr.msk.f32.vlgmr.msra.gmra.mrb[8].mxu0 %vm125_vm1, %v1621_v58 }
 0xb6d   :  { %1201 = vmatprep.mubr.f32.mxu0 %v1461_v26 }
 0xc3f   :  { %v991_v46 = vpop.f32.mrb[8].mxu0 }
 0xc40   :  { %v996_v24 = vsel %vm77_vm0, %v991_v46, 0.0  ;;  %v993_v25 = vpop.f32.mrb[9].mxu0 }
 0xc41   :  { %v997_v27 = vsel %vm77_vm0, %v993_v25, 0.0 }
 0xc42   :  { %v998_v28 = vadd.f32 %v997_v27, %v996_v24 }
 0xc44   :  { %999 = vadd.xlane.f32.xlu1 %v998_v28 }
 0xcd1   :  { %v1000_v29 = vpop.xlane.xlu1 %999 }
 0xcd2   :  { %v1001_v1 = vmul.f32 0.00390625, %v1000_v29 }
 0xcd4   :  { %v1002_v30 = vadd.f32 %v1001_v1, %v1633_v3 }
 0xcd6   :  { %1005 = vperm.xlu0 %1392, %v1002_v30  }
 0xd55   :  { %v1006_v31 = vpop.permute.xlu0 %1005 }
 0xd56   :  { %v1008_v34 = vmul.f32 %v1426_v23, %v1006_v31  ;;  %v1009_v36 = vmul.f32 %v1424_v21, %v1006_v31 }
 0xd58   :  { %1351 = vmatprep.subr.msk.mxu1 %vm77_vm0, %v1009_v36 }
 0xd59   :  { %1352 = vmatpush1.msk.msra.mxu1 %vm77_vm0, %v1008_v34 }
 0xd5a   :  { %1353 = vmatmul.mubr.msk.f32.vlgmr.msra.gmra.mrb[8].mxu1 %vm125_vm1, %v1642_v11 }
 0xd5b   :  { %1290 = vmatprep.mubr.f32.mxu1 %v1461_v26 }
 0xe2d   :  { %v1082_v58 = vpop.f32.mrb[8].mxu1 }
 0xe2e   :  { %v1083_v38 = vadd.f32 %v1082_v58, %v1649_v12  ;;  %v1084_v40 = vpop.f32.mrb[9].mxu1 }
 0xe2f   :  { %v1085_v42 = vadd.f32 %v1084_v40, %v1649_v12 }
 0xe30   :  { %v1766_v3 = vadd.f32 %v1666_v0, %v1083_v38 }
 0xe31   :  { %v1769_v43 = vadd.f32 %v1085_v42, %v1672_v33 }
 0xe32   :  { %v1089_v44 = vsel %vm77_vm0, %v1766_v3, 0.0 }
 0xe33   :  { %v1090_v11 = vsel %vm77_vm0, %v1769_v43, 0.0 }
 0xe34   :  { %v1091_v47 = vadd.f32 %v1090_v11, %v1089_v44 }
 0xe36   :  { %1092 = vadd.xlane.f32.xlu0 %v1091_v47 }
 0xec3   :  { %v1093_v26 = vpop.xlane.xlu0 %1092 }
 0xec4   :  { %v1094_v48 = vrot.slane %v1093_v26, 4 }
 0xec6   :  { %v1095_v49 = vadd.f32 %v1094_v48, %v1093_v26 }
 0xec8   :  { %v1096_v50 = vrot.slane %v1095_v49, 2 }
 0xeca   :  { %v1097_v51 = vadd.f32 %v1096_v50, %v1095_v49 }
 0xecc   :  { %v1098_v12 = vrot.slane %v1097_v51, 1 }
 0xece   :  { %v1099_v52 = vadd.f32 %v1098_v12, %v1097_v51 }
 0xed0   :  { %1380 = vpush %v1099_v52 }
 0xf01   :  { %s1381_s15 = spop %1380 }
 0xf02   :  { %s1101_s0 = smul.f32 0.0009765625, %s1381_s15 }
 0xf04   :  { %v1102_v0 = vstv %s1101_s0 }
 0xf05   :  { %v1103_v33 = vsub.f32 %v1766_v3, %v1102_v0  ;;  %v1104_v53 = vsub.f32 %v1769_v43, %v1102_v0 }
 0xf07   :  { %v1105_v54 = vmul.f32 %v1103_v33, %v1103_v33  ;;  %v1106_v55 = vmul.f32 %v1104_v53, %v1104_v53 }
 0xf09   :  { %v1107_v56 = vsel %vm77_vm0, %v1105_v54, 0.0  ;;  %v1108_v57 = vsel %vm77_vm0, %v1106_v55, 0.0 }
 0xf0a   :  { %v1109_v59 = vadd.f32 %v1108_v57, %v1107_v56 }
 0xf0c   :  { %1110 = vadd.xlane.f32.xlu1 %v1109_v59 }
 0xf1d   :  { %624 = vperm.xlu1 %1391, %v72_v60  }
 0xf99   :  { %v1111_v61 = vpop.xlane.xlu1 %1110 }
 0xf9a   :  { %v1112_v32 = vrot.slane %v1111_v61, 4 }
 0xf9c   :  { %v1113_v35 = vadd.f32 %v1112_v32, %v1111_v61 }
 0xf9d   :  { %v625_v63 = vpop.permute.xlu1 %624 }
 0xf9e   :  { %v1114_v2 = vrot.slane %v1113_v35, 2  ;;  %v703_v8 = vadd.f32 %v1744_v39, %v625_v63  ;;  %v705_v9 = vadd.f32 %v1746_v7, %v625_v63 }
 0xfa0   :  { %v707_v13 = vadd.f32 %v703_v8, %v1654_v17  ;;  %v708_v14 = vadd.f32 %v705_v9, %v1657_v18  ;;  %v1115_v15 = vadd.f32 %v1114_v2, %v1113_v35 }
 0xfa2   :  { %v711_v16 = vcombine.low %v707_v13, %v708_v14  ;;  %v1116_v41 = vrot.slane %v1115_v15, 1 }
 0xfa4   :  { %713 = vst [vmem:[#allocation2] sm:$0xff] %v711_v16  ;;  %v1117_v19 = vadd.f32 %v1116_v41, %v1115_v15 }
 0xfa6   :  { %1382 = vpush %v1117_v19 }
 0xfd7   :  { %s1383_s16 = spop %1382 }
 0xfd8   :  { %s1119_s19 = smul.f32 0.0009765625, %s1383_s16 }
 0xfda   :  { %s1120_s8 = sadd.f32 1e-05, %s1119_s19 }
 0xfdc   :  { %v1121_v20 = vstv %s1120_s8 }
 0xfdd   :  { %1427 = vrsqrt.f32 %v1121_v20 }
 0xfe7   :  { %v1428_v45 = vpop.eup %1427 }
 0xfe8   :  { %1384 = vpush %v1428_v45 }
0x1019   :  { %s1385_s9 = spop %1384 }
0x101a   :  { %v1124_v39 = vstv %s1385_s9 }
0x101b   :  { %v1125_v7 = vmul.f32 %v1124_v39, %v1103_v33  ;;  %v1126_v21 = vmul.f32 %v1124_v39, %v1104_v53 }
0x101d   :  { %v1127_v17 = vmul.f32 %v1125_v7, %v1686_v4  ;;  %v1128_v18 = vmul.f32 %v1126_v21, %v1695_v6 }
0x101f   :  { %v1129_v23 = vadd.f32 %v1127_v17, %v1691_v5  ;;  %v1130_v46 = vadd.f32 %v1128_v18, %v1699_v10 }
0x1021   :  { %1354 = vmatprep.subr.msk.mxu0 %vm77_vm0, %v1130_v46 }
0x1022   :  { %1355 = vmatpush1.msk.msra.mxu0 %vm77_vm0, %v1129_v23 }
0x1023   :  { %1356 = vmatmul.mubr.msk.f32.vlgmr.msra.gmra.mrb[10].mxu0 %vm125_vm1, %v1709_v22 }
0x10f6   :  { %v1203_v24 = vpop.f32.mrb[10].mxu0 }
0x10f7   :  { %v1204_v25 = vadd.f32 %v1203_v24, %v1718_v37  ;;  %v1205_v27 = vpop.f32.mrb[11].mxu0 }
0x10f8   :  { %v1206_v28 = vadd.f32 %v1205_v27, %v1718_v37 }
0x10f9   :  { %v1357_v4 = vmul.f32 -1.442695, %v1204_v25 }
0x10fa   :  { %v1358_v29 = vmul.f32 -1.442695, %v1206_v28 }
0x10fb   :  { %1429 = vpow2.f32 %v1357_v4 }
0x10fc   :  { %1431 = vpow2.f32 %v1358_v29 }
0x1105   :  { %v1430_v5 = vpop.eup %1429 }
0x1106   :  { %v1432_v6 = vpop.eup %1431  ;;  %v1214_v10 = vadd.f32 1.0, %v1430_v5 }
0x1107   :  { %v1215_v1 = vadd.f32 1.0, %v1432_v6 }
0x1109   :  { %1433 = vrcp.f32 %v1215_v1 }
0x110a   :  { %1435 = vrcp.f32 %v1214_v10 }
0x1113   :  { %v1434_v30 = vpop.eup %1433 }
0x1114   :  { %v1436_v31 = vpop.eup %1435  ;;  %1359 = vmatprep.subr.msk.mxu1 %vm77_vm0, %v1434_v30 }
0x1115   :  { %1360 = vmatpush1.msk.msra.mxu1 %vm77_vm0, %v1436_v31 }
0x1116   :  { %1361 = vmatmul.mubr.msk.f32.vlgmr.msra.gmra.mrb[10].mxu1 %vm125_vm1, %v1734_v62 }
0x11e9   :  { %v1292_v22 = vpop.f32.mrb[10].mxu1 }
0x11ea   :  { %v1293_v37 = vadd.f32 %v1292_v22, %v625_v63  ;;  %v1294_v34 = vpop.f32.mrb[11].mxu1 }
0x11eb   :  { %v1295_v36 = vadd.f32 %v1294_v34, %v625_v63 }
0x11ec   :  { %v1297_v58 = vadd.f32 %v1293_v37, %v1766_v3 }
0x11ed   :  { %v1298_v38 = vadd.f32 %v1295_v36, %v1769_v43 }
0x11ef   :  { %v1301_v40 = vcombine.low %v1297_v58, %v1298_v38 }
0x11f1   :  { %1304 = vst [vmem:[#allocation2 + $0x8] sm:$0xff] %v1301_v40 }
0x11f2   :  { %1448 = shalt.err (!%p1445_p4)
}
0x11f3   :  { %s1449_s22 = scalar_lea.hbm %s1831_s17, 256 }
0x11f4   :  { %p1450_p5 = scmp.ne.s32.totalorder %s1831_s17, %s1449_s22  ;;  %p1453_p6 = scmp.lt.u32.totalorder %s1449_s22, %s1831_s17 }
0x11f6   :  { %p1455_p7 = pnand %p1453_p6, %p1450_p5 }
0x11f8   :  { %1458 = shalt.err (!%p1455_p7)
}
0x11f9   :  { %s1464_s25 = smov 128   ;;  %s1465_s6 = smov 8  }
0x11fa   :  { %1316 = dma.vmem_to_hbm [thread:$0]  %s1311_s1, 256, %s1831_s17, [#allocation3], %s1464_s25, %s1464_s25, %s1465_s6  }
0x11fb   :  { %1459 = dma.done.wait [#allocation3], 256  }
0x11fc   :  { %1460 = vsyncadd [#allocation3], 4294967040 }
0x11fd   :  { %1320 = vsyncpa [#allocation3], 1 }

</bundles_post_ra>
